<compile_context>
chip_gen: v6e
topology: v6e:2x2x1
jax: 0.10.0
libtpu: 0.0.40
codegen_flags: <defaults>
</compile_context>

<pallas_src>
import math
import functools

import jax
import jax.numpy as jnp
from jax import lax
from jax.experimental import pallas as pl
from jax.experimental.pallas import tpu as pltpu

RELU_SLOPE = 0.2
ACT_DTYPE = jnp.bfloat16
MIN_PALLAS_N = 512     # below this, pallas_call dispatch dwarfs the work -> jnp.dot


# ----------------------------------------------------------------------------
# Pallas fused matmul kernel: out_i = act(W @ X + b)[rows_i] (+ residual), bf16 out
# ----------------------------------------------------------------------------
def _build_mm_kernel(sigmoid, has_add, splits):
    def kernel(*refs):
        w_ref, x_ref, b_ref, s_ref = refs[0], refs[1], refs[2], refs[3]
        pos = 4
        add_ref = None
        if has_add:
            add_ref = refs[pos]
            pos += 1
        out_refs = refs[pos:]

        acc = jnp.dot(w_ref[...], x_ref[...], preferred_element_type=jnp.float32)
        acc = acc + b_ref[...]                               # (M,1) bias, lane-broadcast
        if sigmoid:
            acc = pl.reciprocal(1.0 + jnp.exp(-acc), approx=True)
        else:
            # per-row PReLU: slope 1.0 -> identity, 0.2 -> LeakyReLU, 0.0 -> ReLU
            acc = jnp.where(acc >= 0.0, acc, s_ref[...] * acc)
        if has_add:
            acc = acc + add_ref[...].astype(jnp.float32)

        off = 0
        for o_ref, m in zip(out_refs, splits):
            o_ref[...] = acc[off:off + m, :].astype(o_ref.dtype)
            off += m
    return kernel


def _pick_tn(N):
    """Largest lane-dense tile dividing N; prefer >=2 grid steps (v7x 2-TC sharding)."""
    for tn in (4096, 2048, 1024, 512, 256, 128):
        if N % tn == 0 and N // tn >= 2:
            return tn
    for tn in (4096, 2048, 1024, 512, 256, 128):
        if N % tn == 0:
            return tn
    return None


def fused_matmul(w, x, bias=None, *, slope=1.0, sigmoid=False, add=None, splits=None):
    """act(W @ X + b) (+ add), W:(M,K), X:(K,N) -> bf16 outputs split along rows.

    MXU sees bf16 operands, f32 accumulation.  `slope` is a per-output-row PReLU
    slope (python float or (M,) vector); sigmoid=True applies a sigmoid epilogue;
    `add` is an optional (M,N) residual fused into the epilogue; `splits` emits one
    lane-dense output per row segment (avoids XLA M-axis slicing afterwards)."""
    M, K = w.shape
    K2, N = x.shape
    assert K == K2
    if splits is None:
        splits = (M,)
    splits = tuple(int(m) for m in splits)
    assert sum(splits) == M

    if bias is None:
        bias = jnp.zeros((M,), jnp.float32)
    b = jnp.asarray(bias, jnp.float32).reshape(M, 1)
    s = jnp.broadcast_to(jnp.asarray(slope, jnp.float32), (M,)).reshape(M, 1)

    tn = _pick_tn(N) if N >= MIN_PALLAS_N else None
    if tn is None:
        # Small / ragged N fallback: plain XLA dot (still bf16 MXU, f32 accumulate).
        acc = jnp.dot(w.astype(jnp.bfloat16), x.astype(jnp.bfloat16),
                      preferred_element_type=jnp.float32)
        acc = acc + b
        if sigmoid:
            acc = jax.nn.sigmoid(acc)
        else:
            acc = jnp.where(acc >= 0.0, acc, s * acc)
        if add is not None:
            acc = acc + add.astype(jnp.float32)
        acc = acc.astype(ACT_DTYPE)
        outs, off = [], 0
        for m in splits:
            outs.append(acc[off:off + m])
            off += m
        return outs[0] if len(splits) == 1 else tuple(outs)

    wb = w.astype(jnp.bfloat16)
    xb = x.astype(jnp.bfloat16)
    has_add = add is not None

    inputs = [wb, xb, b, s]
    in_specs = [
        pl.BlockSpec((M, K), lambda j: (0, 0)),     # weights (resident)
        pl.BlockSpec((K, tn), lambda j: (0, j)),    # activations (lane tile)
        pl.BlockSpec((M, 1), lambda j: (0, 0)),     # bias
        pl.BlockSpec((M, 1), lambda j: (0, 0)),     # per-row prelu slope
    ]
    if has_add:
        inputs.append(add.astype(ACT_DTYPE))
        in_specs.append(pl.BlockSpec((M, tn), lambda j: (0, j)))

    out_shape = tuple(jax.ShapeDtypeStruct((m, N), ACT_DTYPE) for m in splits)
    out_specs = [pl.BlockSpec((m, tn), lambda j: (0, j)) for m in splits]

    flops = int(2 * M * K * N + 4 * M * N)
    transcendentals = int(M * N) if sigmoid else 0
    bytes_accessed = int(2 * (M * K + K * N + M * N * (2 if has_add else 1)) + 8 * M)

    outs = pl.pallas_call(
        _build_mm_kernel(sigmoid, has_add, splits),
        out_shape=out_shape,
        grid_spec=pltpu.PrefetchScalarGridSpec(
            num_scalar_prefetch=0,
            grid=(N // tn,),
            in_specs=in_specs,
            out_specs=out_specs,
        ),
        compiler_params=pltpu.CompilerParams(
            dimension_semantics=("parallel",)),
        cost_estimate=pl.CostEstimate(flops=flops,
                                      transcendentals=transcendentals,
                                      bytes_accessed=bytes_accessed),
    )(*inputs)
    return outs[0] if len(splits) == 1 else outs


# ----------------------------------------------------------------------------
# Layer helpers (channel-major layout (C, B, H, W) everywhere)
# ----------------------------------------------------------------------------
def conv1x1(x, p, *, slope=1.0, sigmoid=False, add=None):
    """1x1 conv as one lane-dense Pallas matmul with fused bias/act/residual."""
    C, B, H, W = x.shape
    Cout = p['w'].shape[0]
    add2 = None if add is None else add.reshape(add.shape[0], B * H * W)
    y = fused_matmul(p['w'].reshape(Cout, C), x.reshape(C, B * H * W), p['b'],
                     slope=slope, sigmoid=sigmoid, add=add2)
    return y.reshape(Cout, B, H, W)


def conv2d_lax(x, p, *, stride=1, padding=None, slope=1.0, sigmoid=False,
               add=None, groups=1):
    """k>1 spatial conv on the (C, B, H, W) layout via XLA's conv emitter
    (no HBM im2col).  bf16 operands, f32 accumulation, bf16 result."""
    w = p['w']
    kh = w.shape[2]
    pad = kh // 2 if padding is None else padding
    y = lax.conv_general_dilated(
        x.astype(jnp.bfloat16), w.astype(jnp.bfloat16),
        window_strides=(stride, stride),
        padding=((pad, pad), (pad, pad)),
        dimension_numbers=('CNHW', 'OIHW', 'CNHW'),
        feature_group_count=groups,
        preferred_element_type=jnp.float32)
    if p['b'] is not None:
        y = y + p['b'][:, None, None, None]
    if sigmoid:
        y = jax.nn.sigmoid(y)
    elif slope != 1.0:
        y = jnp.where(y >= 0.0, y, slope * y)
    if add is not None:
        y = y + add.astype(jnp.float32)
    return y.astype(ACT_DTYPE)


def dwconv3x3(x, p):
    return conv2d_lax(x, p, groups=x.shape[0])


def convtranspose2x2(x, p):
    """ConvTranspose2d(k=2, s=2) as an lhs-dilated conv (no 6-D transpose).
    out[co, b, 2h+i, 2w+j] = b[co] + sum_ci w[ci, co, i, j] * x[ci, b, h, w]."""
    w = jnp.flip(p['w'], axis=(2, 3)).transpose(1, 0, 2, 3)   # (Cout, Cin, 2, 2)
    y = lax.conv_general_dilated(
        x.astype(jnp.bfloat16), w.astype(jnp.bfloat16),
        window_strides=(1, 1),
        padding=((1, 1), (1, 1)),
        lhs_dilation=(2, 2),
        dimension_numbers=('CNHW', 'OIHW', 'CNHW'),
        preferred_element_type=jnp.float32)
    y = y + p['b'][:, None, None, None]
    return y.astype(ACT_DTYPE)


def layernorm_chw(x, eps=1e-5):
    """nn.LayerNorm([C,H,W]) freshly constructed in forward => weight=1, bias=0.
    x is (C, B, H, W): normalize over (C, H, W) per batch element."""
    xf = x.astype(jnp.float32)
    mu = jnp.mean(xf, axis=(0, 2, 3), keepdims=True)
    var = jnp.mean((xf - mu) ** 2, axis=(0, 2, 3), keepdims=True)
    return ((xf - mu) * lax.rsqrt(var + eps)).astype(ACT_DTYPE)


def _block_diag(w1, w2):
    o1, i1 = w1.shape
    o2, i2 = w2.shape
    top = jnp.concatenate([w1, jnp.zeros((o1, i2), jnp.float32)], axis=1)
    bot = jnp.concatenate([jnp.zeros((o2, i1), jnp.float32), w2], axis=1)
    return jnp.concatenate([top, bot], axis=0)


# ----------------------------------------------------------------------------
# Fused dual cross-attention (both MultiheadAttention(embed_dim=C, num_heads=1))
# ----------------------------------------------------------------------------
def mha_pair(p_r, p_i, p_c6, x10_re, x10_im, x1):
    """Both single-head cross-attentions of FCFE with fused projections.
    Inputs are (C, B, H, W); the PyTorch module feeds (B, H*W, C) to a
    batch_first=False MHA, so the attention sequence length is B."""
    E, B, H, W = x1.shape
    HW = H * W
    N = B * HW
    scale = 1.0 / math.sqrt(E)

    # K/V projections of both heads composed with conv1x1_6 (both linear -> exact
    # weight composition), one matmul producing four lane-dense outputs.
    W6 = p_c6['w'][:, :, 0, 0]
    b6 = p_c6['b']
    Wkv = jnp.concatenate([p_r['in_w'][E:3 * E], p_i['in_w'][E:3 * E]], axis=0)  # (4E, E)
    bkv = jnp.concatenate([p_r['in_b'][E:3 * E], p_i['in_b'][E:3 * E]], axis=0)
    K_r, V_r, K_i, V_i = fused_matmul(Wkv @ W6, x1.reshape(E, N), Wkv @ b6 + bkv,
                                      splits=(E, E, E, E))
    K_r, V_r, K_i, V_i = (t.reshape(E, B, HW) for t in (K_r, V_r, K_i, V_i))

    # Q projections (block-diagonal over real/imag), 1/sqrt(E) folded in.
    Wq = _block_diag(p_r['in_w'][:E] * scale, p_i['in_w'][:E] * scale)
    bq = jnp.concatenate([p_r['in_b'][:E], p_i['in_b'][:E]]) * scale
    q_in = jnp.concatenate([x10_re, x10_im], axis=0).reshape(2 * E, N)
    Q_r, Q_i = fused_matmul(Wq, q_in, bq, splits=(E, E))
    Q_r = Q_r.reshape(E, B, HW)
    Q_i = Q_i.reshape(E, B, HW)

    def attend(Q, K, V):
        Qf, Kf, Vf = (t.astype(jnp.float32) for t in (Q, K, V))
        scores = jnp.einsum('eln,emn->nlm', Qf, Kf)          # (HW, B, B) -- tiny
        attn = jax.nn.softmax(scores, axis=-1)
        return jnp.einsum('nlm,emn->eln', attn, Vf)          # (E, B, HW)

    ao_r = attend(Q_r, K_r, V_r)
    ao_i = attend(Q_i, K_i, V_i)

    # Output projections, block-diagonal -> one matmul, two lane-dense outputs.
    Wo = _block_diag(p_r['out_w'], p_i['out_w'])
    bo = jnp.concatenate([p_r['out_b'], p_i['out_b']])
    ao = jnp.concatenate([ao_r, ao_i], axis=0).reshape(2 * E, N)
    xr, xi = fused_matmul(Wo, ao, bo, splits=(E, E))
    return xr.reshape(E, B, H, W), xi.reshape(E, B, H, W)


# ----------------------------------------------------------------------------
# Parameter construction (deterministic, in-script)
# ----------------------------------------------------------------------------
class ParamGen:
    def __init__(self, seed=0):
        self.key = jax.random.PRNGKey(seed)
        self.count = 0

    def take(self, shape, scale):
        self.count += 1
        k = jax.random.fold_in(self.key, self.count)
        return jax.random.normal(k, shape, jnp.float32) * scale


def conv_p(g, cin, cout, k, bias=True):
    fan_in = cin * k * k
    return {'w': g.take((cout, cin, k, k), 1.0 / math.sqrt(fan_in)),
            'b': g.take((cout,), 0.01) if bias else None}


def dwconv_p(g, c):
    return {'w': g.take((c, 1, 3, 3), 1.0 / 3.0), 'b': g.take((c,), 0.01)}


def convT_p(g, cin, cout):
    return {'w': g.take((cin, cout, 2, 2), 1.0 / math.sqrt(cin * 4)),
            'b': g.take((cout,), 0.01)}


def mha_p(g, e):
    return {'in_w': g.take((3 * e, e), 1.0 / math.sqrt(e)),
            'in_b': g.take((3 * e,), 0.01),
            'out_w': g.take((e, e), 1.0 / math.sqrt(e)),
            'out_b': g.take((e,), 0.01)}


def unet_conv_block_p(g, in_size, out_size, downsample):
    p = {'identity': conv_p(g, in_size, out_size, 1, True),
         'conv_1': conv_p(g, in_size, out_size, 3, True),
         'conv_2': conv_p(g, out_size, out_size, 3, True)}
    if downsample:
        p['down'] = conv_p(g, out_size, out_size, 4, False)
    return p


def unet_ev_block_p(g, in_size, out_size, downsample):
    p = {'identity': conv_p(g, in_size, out_size, 1, True),
         'conv_1': conv_p(g, in_size, out_size, 3, True),
         'conv_2': conv_p(g, out_size, out_size, 3, True),
         'conv_before_merge': conv_p(g, out_size, out_size, 1, True)}
    if downsample:
        p['down'] = conv_p(g, out_size, out_size, 4, False)
    return p


def up_block_p(g, in_size, out_size):
    return {'up': convT_p(g, in_size, out_size),
            'conv_block': unet_conv_block_p(g, in_size, out_size, False)}


def fcfe_p(g, c):
    return {
        'conv1x1_1': conv_p(g, 2 * c, c, 1, True),
        'dw1': dwconv_p(g, c), 'dw2': dwconv_p(g, c), 'dw3': dwconv_p(g, c),
        'conv1x1_real': conv_p(g, c, c, 1, True),
        'conv1x1_imag': conv_p(g, c, c, 1, True),
        'conv1x1_2': conv_p(g, c, c, 1, True),
        'conv1x1_3_real': conv_p(g, c, c, 1, True),
        'conv1x1_3_imag': conv_p(g, c, c, 1, True),
        'conv1x1_4_real': conv_p(g, c, c, 1, True),
        'conv1x1_4_imag': conv_p(g, c, c, 1, True),
        'conv1x1_5': conv_p(g, 2 * c, c, 1, True),
        'conv1x1_6': conv_p(g, c, c, 1, True),
        'conv1x1_7': conv_p(g, c, c, 1, True),
        'channel_attention': conv_p(g, c, c, 1, True),
        'filter_generation': conv_p(g, c, c, 1, True),
        'mha_real': mha_p(g, c),
        'mha_imag': mha_p(g, c),
    }


def build_efnet_params(in_chn=3, ev_chn=6, wf=8, depth=3, seed=0):
    g = ParamGen(seed)
    p = {}
    p['conv_ev1'] = conv_p(g, ev_chn, wf, 3, True)
    p['conv_01'] = conv_p(g, in_chn, wf, 3, True)
    p['conv_02'] = conv_p(g, in_chn, wf, 3, True)
    p['down_path_ev'] = []
    p['down_path_1'] = []
    p['down_path_2'] = []
    prev = wf
    for i in range(depth):
        downsample = (i + 1 < depth)
        out = (2 ** i) * wf
        p['down_path_1'].append(unet_conv_block_p(g, prev, out, downsample))
        p['down_path_2'].append(unet_conv_block_p(g, prev, out, downsample))
        p['down_path_ev'].append(unet_ev_block_p(g, prev, out, downsample))
        prev = out
    p['up_path_1'], p['up_path_2'] = [], []
    p['skip_conv_1'], p['skip_conv_2'] = [], []
    for i in reversed(range(depth - 1)):
        out = (2 ** i) * wf
        p['up_path_1'].append(up_block_p(g, prev, out))
        p['up_path_2'].append(up_block_p(g, prev, out))
        p['skip_conv_1'].append(conv_p(g, out, out, 3, True))
        p['skip_conv_2'].append(conv_p(g, out, out, 3, True))
        prev = out
    p['sam12'] = {'conv1': conv_p(g, prev, prev, 3, True),
                  'conv2': conv_p(g, prev, 3, 3, True),
                  'conv3': conv_p(g, 3, prev, 3, True)}
    p['cat12'] = conv_p(g, prev * 3, prev, 1, True)
    p['last'] = conv_p(g, prev, in_chn, 3, True)
    p['fcfe'] = fcfe_p(g, wf)
    return p


# ----------------------------------------------------------------------------
# Forward passes (all tensors are channel-major (C, B, H, W), bf16 activations)
# ----------------------------------------------------------------------------
def unet_conv_block_fwd(p, x, event_filter=None, downsample=False):
    out1 = conv2d_lax(x, p['conv_1'], slope=RELU_SLOPE)
    out2 = conv2d_lax(out1, p['conv_2'], slope=RELU_SLOPE)
    out = conv1x1(x, p['identity'], add=out2)            # identity(x) + out2, fused
    if event_filter is not None:
        # TODO(synk): EventImage_ChannelAttentionTransformerBlock is not defined in the
        # provided source file; approximated with additive event fusion.
        out = out + event_filter
    if downsample:
        out_down = conv2d_lax(out, p['down'], stride=2, padding=1)
        return out_down, out
    return out


def unet_ev_block_fwd(p, x, downsample=False):
    out1 = conv2d_lax(x, p['conv_1'], slope=RELU_SLOPE)
    out2 = conv2d_lax(out1, p['conv_2'], slope=RELU_SLOPE)
    out = conv1x1(x, p['identity'], add=out2)
    if downsample:
        out_down = conv2d_lax(out, p['down'], stride=2, padding=1)
        out_m = conv1x1(out, p['conv_before_merge'])
        return out_down, out_m
    return conv1x1(out, p['conv_before_merge'])


def up_block_fwd(p, x, bridge):
    up = convtranspose2x2(x, p['up'])
    out = jnp.concatenate([up, bridge], axis=0)
    return unet_conv_block_fwd(p['conv_block'], out, downsample=False)


def sam_fwd(p, x, x_img):
    x1 = conv2d_lax(x, p['conv1'])
    img = conv2d_lax(x, p['conv2'], add=x_img)
    x2 = conv2d_lax(img, p['conv3'], sigmoid=True)
    x1 = x1 * x2 + x
    return x1, img


def fcfe_fwd(p, event_features, image_features):
    C, B, H, W = event_features.shape
    N = B * H * W
    x1 = layernorm_chw(event_features)
    x2 = layernorm_chw(image_features)
    x3 = conv1x1(jnp.concatenate([x1, x2], axis=0), p['conv1x1_1'])
    x4 = jnp.fft.fft2(dwconv3x3(x3, p['dw1']).astype(jnp.float32))

    # conv1x1_real + conv1x1_imag (+ ReLU) as one block-diagonal matmul; its output
    # is exactly the cat([real, imag]) input of conv1x1_5 (sigmoid fused).
    ri = jnp.concatenate([jnp.real(x4), jnp.imag(x4)], axis=0).reshape(2 * C, N)
    w_ri = _block_diag(p['conv1x1_real']['w'][:, :, 0, 0],
                       p['conv1x1_imag']['w'][:, :, 0, 0])
    b_ri = jnp.concatenate([p['conv1x1_real']['b'], p['conv1x1_imag']['b']])
    realimag = fused_matmul(w_ri, ri, b_ri, slope=0.0)                  # ReLU
    x5 = fused_matmul(p['conv1x1_5']['w'].reshape(C, 2 * C), realimag,
                      p['conv1x1_5']['b'], sigmoid=True).reshape(C, B, H, W)

    x6 = jnp.fft.fft2(dwconv3x3(conv1x1(x2, p['conv1x1_2']),
                                p['dw2']).astype(jnp.float32))
    product = x5.astype(jnp.float32) * x6

    # conv1x1_4_* (+ReLU) then conv1x1_3_* : two block-diagonal matmuls total.
    pri = jnp.concatenate([jnp.real(product), jnp.imag(product)],
                          axis=0).reshape(2 * C, N)
    w4 = _block_diag(p['conv1x1_4_real']['w'][:, :, 0, 0],
                     p['conv1x1_4_imag']['w'][:, :, 0, 0])
    b4 = jnp.concatenate([p['conv1x1_4_real']['b'], p['conv1x1_4_imag']['b']])
    t = fused_matmul(w4, pri, b4, slope=0.0)                            # ReLU
    w3 = _block_diag(p['conv1x1_3_real']['w'][:, :, 0, 0],
                     p['conv1x1_3_imag']['w'][:, :, 0, 0])
    b3 = jnp.concatenate([p['conv1x1_3_real']['b'], p['conv1x1_3_imag']['b']])
    pr, pi = fused_matmul(w3, t, b3, splits=(C, C))
    x7 = jnp.fft.ifft2(pr.astype(jnp.float32).reshape(C, B, H, W)
                       + 1j * pi.astype(jnp.float32).reshape(C, B, H, W))

    x8 = jnp.fft.fft(x7.reshape(C * B, H, W), axis=-1)
    # filter_generation(channel_attention(x)) with no nonlinearity in between:
    # compose into a single 1x1 conv (exact).
    Wc = p['channel_attention']['w'][:, :, 0, 0]
    bc = p['channel_attention']['b']
    Wf = p['filter_generation']['w'][:, :, 0, 0]
    bf = p['filter_generation']['b']
    x9_in = (jnp.real(x7) + jnp.imag(x7) + x3.astype(jnp.float32)).reshape(C, N)
    x9 = fused_matmul(Wf @ Wc, x9_in, Wf @ bc + bf)
    x9 = x9.astype(jnp.float32).reshape(C * B, H, W)
    x10 = jnp.fft.ifft(x8 * x9, axis=-1).reshape(C, B, H, W)

    xr, xi = mha_pair(p['mha_real'], p['mha_imag'], p['conv1x1_6'],
                      jnp.real(x10), jnp.imag(x10), x1)
    mag = jnp.sqrt(xr.astype(jnp.float32) ** 2 + xi.astype(jnp.float32) ** 2)
    g = jax.nn.gelu(dwconv3x3(mag.astype(ACT_DTYPE), p['dw3']).astype(jnp.float32),
                    approximate=False)
    # x11 + x2 fused into the conv1x1_7 epilogue
    return conv1x1(g.astype(ACT_DTYPE), p['conv1x1_7'], add=x2)


def efnet_fwd(params, x_nchw, event_nchw, depth=3):
    # Channel-major internal layout so 1x1 / projection matmuls are lane-dense.
    image = x_nchw.transpose(1, 0, 2, 3).astype(ACT_DTYPE)
    event = event_nchw.transpose(1, 0, 2, 3).astype(ACT_DTYPE)

    # ----- event encoder path -----
    e1 = conv2d_lax(event, params['conv_ev1'])
    e1_clone = e1
    ev = []
    for i in range(depth):
        blk = params['down_path_ev'][i]
        if i < depth - 1:
            e1, e1_up = unet_ev_block_fwd(blk, e1, downsample=True)
            ev.append(e1_up)
        else:
            e1 = unet_ev_block_fwd(blk, e1, downsample=False)
            ev.append(e1)

    # ----- image path 1 -----
    x1 = conv2d_lax(image, params['conv_01'])
    output_fcfe = fcfe_fwd(params['fcfe'], e1_clone, x1)

    encs = []
    for i in range(depth):
        blk = params['down_path_1'][i]
        if i + 1 < depth:
            x1, x1_up = unet_conv_block_fwd(blk, x1, event_filter=ev[i],
                                            downsample=True)
            encs.append(x1_up)
        else:
            x1 = unet_conv_block_fwd(blk, x1, event_filter=ev[i], downsample=False)

    for i in range(depth - 1):
        bridge = conv2d_lax(encs[-i - 1], params['skip_conv_1'][i])
        x1 = up_block_fwd(params['up_path_1'][i], x1, bridge)

    sam_feature, out_1 = sam_fwd(params['sam12'], x1, image)

    # ----- image path 2 -----
    x2 = conv2d_lax(image, params['conv_02'])
    x2 = conv1x1(jnp.concatenate([x2, sam_feature, output_fcfe], axis=0),
                 params['cat12'])
    blocks = []
    for i in range(depth):
        blk = params['down_path_2'][i]
        if i + 1 < depth:
            # mask is None in this forward => emgc branch is skipped (same as PyTorch)
            x2, x2_up = unet_conv_block_fwd(blk, x2, downsample=True)
            blocks.append(x2_up)
        else:
            x2 = unet_conv_block_fwd(blk, x2, downsample=False)

    for i in range(depth - 1):
        bridge = conv2d_lax(blocks[-i - 1], params['skip_conv_2'][i])
        x2 = up_block_fwd(params['up_path_2'][i], x2, bridge)

    out_2 = conv2d_lax(x2, params['last'], add=image)
    # back to NCHW, f32 outputs
    return (out_1.transpose(1, 0, 2, 3).astype(jnp.float32),
            out_2.transpose(1, 0, 2, 3).astype(jnp.float32))


# ----------------------------------------------------------------------------
# Main
# ----------------------------------------------------------------------------
if __name__ == "__main__":
    B, H, W = 2, 16, 16
    in_chn, ev_chn, wf, depth = 3, 6, 8, 3

    key = jax.random.PRNGKey(0)
    kx, ke = jax.random.split(key)
    x = jax.random.normal(kx, (B, in_chn, H, W), jnp.float32)
    event = jax.random.normal(ke, (B, ev_chn, H, W), jnp.float32)

    params = build_efnet_params(in_chn=in_chn, ev_chn=ev_chn, wf=wf,
                                depth=depth, seed=0)

    fwd = jax.jit(functools.partial(efnet_fwd, depth=depth))
    out_1, out_2 = fwd(params, x, event)
    jax.block_until_ready((out_1, out_2))

    assert out_1.shape == (B, in_chn, H, W)
    assert out_2.shape == (B, in_chn, H, W)
    assert jnp.all(jnp.isfinite(out_1)) and jnp.all(jnp.isfinite(out_2))
    print("KERNEL_OK")
</pallas_src>

<mosaic_0001>
module attributes {stable_mosaic.version = 11 : i64} {
  func.func @kernel(%arg0: i32, %arg1: memref<32x8xbf16, #tpu.memory_space<vmem>>, %arg2: memref<8x256xbf16, #tpu.memory_space<vmem>>, %arg3: memref<32x1xf32, #tpu.memory_space<vmem>>, %arg4: memref<32x1xf32, #tpu.memory_space<vmem>>, %arg5: memref<8x256xbf16, #tpu.memory_space<vmem>>, %arg6: memref<8x256xbf16, #tpu.memory_space<vmem>>, %arg7: memref<8x256xbf16, #tpu.memory_space<vmem>>, %arg8: memref<8x256xbf16, #tpu.memory_space<vmem>>) attributes {dimension_semantics = [#tpu.dimension_semantics<parallel>], iteration_bounds = array<i64: 2>, scalar_prefetch = 0 : i64, scratch_operands = 0 : i64, tpu.core_type = #tpu.core_type<tc>, window_params = [{pipeline_mode = #tpu.pipeline_mode<synchronous>, transform_indices = @transform_0, window_bounds = array<i64: 32, 8>}, {transform_indices = @transform_1, window_bounds = array<i64: 8, 256>}, {pipeline_mode = #tpu.pipeline_mode<synchronous>, transform_indices = @transform_2, window_bounds = array<i64: 32, 1>}, {pipeline_mode = #tpu.pipeline_mode<synchronous>, transform_indices = @transform_3, window_bounds = array<i64: 32, 1>}, {transform_indices = @transform_4, window_bounds = array<i64: 8, 256>}, {transform_indices = @transform_5, window_bounds = array<i64: 8, 256>}, {transform_indices = @transform_6, window_bounds = array<i64: 8, 256>}, {transform_indices = @transform_7, window_bounds = array<i64: 8, 256>}]} {
    %c0 = arith.constant 0 : index
    %c0_0 = arith.constant 0 : index
    %0 = vector.load %arg1[%c0, %c0_0] : memref<32x8xbf16, #tpu.memory_space<vmem>>, vector<32x8xbf16>
    %c0_1 = arith.constant 0 : index
    %c0_2 = arith.constant 0 : index
    %1 = vector.load %arg2[%c0_1, %c0_2] : memref<8x256xbf16, #tpu.memory_space<vmem>>, vector<8x256xbf16>
    %cst = arith.constant dense<0.000000e+00> : vector<32x256xf32>
    %2 = tpu.matmul %0, %1, %cst {dimension_numbers = #tpu.dot_dimension_numbers<[1], [0], [0], [1], [0, 0, 1, 1], [], []>} : vector<32x8xbf16>, vector<8x256xbf16>, vector<32x256xf32> -> vector<32x256xf32>
    %c0_3 = arith.constant 0 : index
    %c0_4 = arith.constant 0 : index
    %3 = vector.load %arg3[%c0_3, %c0_4] : memref<32x1xf32, #tpu.memory_space<vmem>>, vector<32x1xf32>
    %4 = vector.broadcast %3 : vector<32x1xf32> to vector<32x256xf32>
    %5 = arith.addf %2, %4 : vector<32x256xf32>
    %cst_5 = arith.constant 0.000000e+00 : f32
    %6 = vector.broadcast %cst_5 : f32 to vector<32x256xf32>
    %7 = arith.cmpf oge, %5, %6 : vector<32x256xf32>
    %c0_6 = arith.constant 0 : index
    %c0_7 = arith.constant 0 : index
    %8 = vector.load %arg4[%c0_6, %c0_7] : memref<32x1xf32, #tpu.memory_space<vmem>>, vector<32x1xf32>
    %9 = vector.broadcast %8 : vector<32x1xf32> to vector<32x256xf32>
    %10 = arith.mulf %9, %5 : vector<32x256xf32>
    %11 = arith.select %7, %5, %10 : vector<32x256xi1>, vector<32x256xf32>
    %12 = vector.extract_strided_slice %11 {offsets = [0, 0], sizes = [8, 256], strides = [1, 1]} : vector<32x256xf32> to vector<8x256xf32>
    %13 = arith.truncf %12 : vector<8x256xf32> to vector<8x256xbf16>
    %c0_8 = arith.constant 0 : index
    %c0_9 = arith.constant 0 : index
    %14 = vector.load %arg5[%c0_8, %c0_9] : memref<8x256xbf16, #tpu.memory_space<vmem>>, vector<8x256xbf16>
    tpu.vector_store %arg5[%c0_8, %c0_9], %13 {strides = array<i32>} : memref<8x256xbf16, #tpu.memory_space<vmem>>, vector<8x256xbf16>,
    %15 = vector.extract_strided_slice %11 {offsets = [8, 0], sizes = [8, 256], strides = [1, 1]} : vector<32x256xf32> to vector<8x256xf32>
    %16 = arith.truncf %15 : vector<8x256xf32> to vector<8x256xbf16>
    %c0_10 = arith.constant 0 : index
    %c0_11 = arith.constant 0 : index
    %17 = vector.load %arg6[%c0_10, %c0_11] : memref<8x256xbf16, #tpu.memory_space<vmem>>, vector<8x256xbf16>
    tpu.vector_store %arg6[%c0_10, %c0_11], %16 {strides = array<i32>} : memref<8x256xbf16, #tpu.memory_space<vmem>>, vector<8x256xbf16>,
    %18 = vector.extract_strided_slice %11 {offsets = [16, 0], sizes = [8, 256], strides = [1, 1]} : vector<32x256xf32> to vector<8x256xf32>
    %19 = arith.truncf %18 : vector<8x256xf32> to vector<8x256xbf16>
    %c0_12 = arith.constant 0 : index
    %c0_13 = arith.constant 0 : index
    %20 = vector.load %arg7[%c0_12, %c0_13] : memref<8x256xbf16, #tpu.memory_space<vmem>>, vector<8x256xbf16>
    tpu.vector_store %arg7[%c0_12, %c0_13], %19 {strides = array<i32>} : memref<8x256xbf16, #tpu.memory_space<vmem>>, vector<8x256xbf16>,
    %21 = vector.extract_strided_slice %11 {offsets = [24, 0], sizes = [8, 256], strides = [1, 1]} : vector<32x256xf32> to vector<8x256xf32>
    %22 = arith.truncf %21 : vector<8x256xf32> to vector<8x256xbf16>
    %c0_14 = arith.constant 0 : index
    %c0_15 = arith.constant 0 : index
    %23 = vector.load %arg8[%c0_14, %c0_15] : memref<8x256xbf16, #tpu.memory_space<vmem>>, vector<8x256xbf16>
    tpu.vector_store %arg8[%c0_14, %c0_15], %22 {strides = array<i32>} : memref<8x256xbf16, #tpu.memory_space<vmem>>, vector<8x256xbf16>,
    return
  }
  func.func @transform_0(%arg0: i32) -> (i32, i32) {
    %c0_i32 = arith.constant 0 : i32
    %c0_i32_0 = arith.constant 0 : i32
    %c0_i32_1 = arith.constant 0 : i32
    return %c0_i32, %c0_i32_0 : i32, i32
  }
  func.func @transform_1(%arg0: i32) -> (i32, i32) {
    %c0_i32 = arith.constant 0 : i32
    %c0_i32_0 = arith.constant 0 : i32
    return %c0_i32, %arg0 : i32, i32
  }
  func.func @transform_2(%arg0: i32) -> (i32, i32) {
    %c0_i32 = arith.constant 0 : i32
    %c0_i32_0 = arith.constant 0 : i32
    %c0_i32_1 = arith.constant 0 : i32
    return %c0_i32, %c0_i32_0 : i32, i32
  }
  func.func @transform_3(%arg0: i32) -> (i32, i32) {
    %c0_i32 = arith.constant 0 : i32
    %c0_i32_0 = arith.constant 0 : i32
    %c0_i32_1 = arith.constant 0 : i32
    return %c0_i32, %c0_i32_0 : i32, i32
  }
  func.func @transform_4(%arg0: i32) -> (i32, i32) {
    %c0_i32 = arith.constant 0 : i32
    %c0_i32_0 = arith.constant 0 : i32
    return %c0_i32, %arg0 : i32, i32
  }
  func.func @transform_5(%arg0: i32) -> (i32, i32) {
    %c0_i32 = arith.constant 0 : i32
    %c0_i32_0 = arith.constant 0 : i32
    return %c0_i32, %arg0 : i32, i32
  }
  func.func @transform_6(%arg0: i32) -> (i32, i32) {
    %c0_i32 = arith.constant 0 : i32
    %c0_i32_0 = arith.constant 0 : i32
    return %c0_i32, %arg0 : i32, i32
  }
  func.func @transform_7(%arg0: i32) -> (i32, i32) {
    %c0_i32 = arith.constant 0 : i32
    %c0_i32_0 = arith.constant 0 : i32
    return %c0_i32, %arg0 : i32, i32
  }
}

module attributes {stable_mosaic.version = 11 : i64} {
  func.func @kernel(%arg0: i32, %arg1: memref<8x16xbf16, #tpu.memory_space<vmem>>, %arg2: memref<16x256xbf16, #tpu.memory_space<vmem>>, %arg3: memref<8x1xf32, #tpu.memory_space<vmem>>, %arg4: memref<8x1xf32, #tpu.memory_space<vmem>>, %arg5: memref<8x256xbf16, #tpu.memory_space<vmem>>) attributes {dimension_semantics = [#tpu.dimension_semantics<parallel>], iteration_bounds = array<i64: 2>, scalar_prefetch = 0 : i64, scratch_operands = 0 : i64, tpu.core_type = #tpu.core_type<tc>, window_params = [{pipeline_mode = #tpu.pipeline_mode<synchronous>, transform_indices = @transform_0, window_bounds = array<i64: 8, 16>}, {transform_indices = @transform_1, window_bounds = array<i64: 16, 256>}, {pipeline_mode = #tpu.pipeline_mode<synchronous>, transform_indices = @transform_2, window_bounds = array<i64: 8, 1>}, {pipeline_mode = #tpu.pipeline_mode<synchronous>, transform_indices = @transform_3, window_bounds = array<i64: 8, 1>}, {transform_indices = @transform_4, window_bounds = array<i64: 8, 256>}]} {
    %c0 = arith.constant 0 : index
    %c0_0 = arith.constant 0 : index
    %0 = vector.load %arg1[%c0, %c0_0] : memref<8x16xbf16, #tpu.memory_space<vmem>>, vector<8x16xbf16>
    %c0_1 = arith.constant 0 : index
    %c0_2 = arith.constant 0 : index
    %1 = vector.load %arg2[%c0_1, %c0_2] : memref<16x256xbf16, #tpu.memory_space<vmem>>, vector<16x256xbf16>
    %cst = arith.constant dense<0.000000e+00> : vector<8x256xf32>
    %2 = tpu.matmul %0, %1, %cst {dimension_numbers = #tpu.dot_dimension_numbers<[1], [0], [0], [1], [0, 0, 1, 1], [], []>} : vector<8x16xbf16>, vector<16x256xbf16>, vector<8x256xf32> -> vector<8x256xf32>
    %c0_3 = arith.constant 0 : index
    %c0_4 = arith.constant 0 : index
    %3 = vector.load %arg3[%c0_3, %c0_4] : memref<8x1xf32, #tpu.memory_space<vmem>>, vector<8x1xf32>
    %4 = vector.broadcast %3 : vector<8x1xf32> to vector<8x256xf32>
    %5 = arith.addf %2, %4 : vector<8x256xf32>
    %cst_5 = arith.constant 0.000000e+00 : f32
    %6 = vector.broadcast %cst_5 : f32 to vector<8x256xf32>
    %7 = arith.cmpf oge, %5, %6 : vector<8x256xf32>
    %c0_6 = arith.constant 0 : index
    %c0_7 = arith.constant 0 : index
    %8 = vector.load %arg4[%c0_6, %c0_7] : memref<8x1xf32, #tpu.memory_space<vmem>>, vector<8x1xf32>
    %9 = vector.broadcast %8 : vector<8x1xf32> to vector<8x256xf32>
    %10 = arith.mulf %9, %5 : vector<8x256xf32>
    %11 = arith.select %7, %5, %10 : vector<8x256xi1>, vector<8x256xf32>
    %12 = arith.truncf %11 : vector<8x256xf32> to vector<8x256xbf16>
    %c0_8 = arith.constant 0 : index
    %c0_9 = arith.constant 0 : index
    %13 = vector.load %arg5[%c0_8, %c0_9] : memref<8x256xbf16, #tpu.memory_space<vmem>>, vector<8x256xbf16>
    tpu.vector_store %arg5[%c0_8, %c0_9], %12 {strides = array<i32>} : memref<8x256xbf16, #tpu.memory_space<vmem>>, vector<8x256xbf16>,
    return
  }
  func.func @transform_0(%arg0: i32) -> (i32, i32) {
    %c0_i32 = arith.constant 0 : i32
    %c0_i32_0 = arith.constant 0 : i32
    %c0_i32_1 = arith.constant 0 : i32
    return %c0_i32, %c0_i32_0 : i32, i32
  }
  func.func @transform_1(%arg0: i32) -> (i32, i32) {
    %c0_i32 = arith.constant 0 : i32
    %c0_i32_0 = arith.constant 0 : i32
    return %c0_i32, %arg0 : i32, i32
  }
  func.func @transform_2(%arg0: i32) -> (i32, i32) {
    %c0_i32 = arith.constant 0 : i32
    %c0_i32_0 = arith.constant 0 : i32
    %c0_i32_1 = arith.constant 0 : i32
    return %c0_i32, %c0_i32_0 : i32, i32
  }
  func.func @transform_3(%arg0: i32) -> (i32, i32) {
    %c0_i32 = arith.constant 0 : i32
    %c0_i32_0 = arith.constant 0 : i32
    %c0_i32_1 = arith.constant 0 : i32
    return %c0_i32, %c0_i32_0 : i32, i32
  }
  func.func @transform_4(%arg0: i32) -> (i32, i32) {
    %c0_i32 = arith.constant 0 : i32
    %c0_i32_0 = arith.constant 0 : i32
    return %c0_i32, %arg0 : i32, i32
  }
}

module attributes {stable_mosaic.version = 11 : i64} {
  func.func @kernel(%arg0: i32, %arg1: memref<16x16xbf16, #tpu.memory_space<vmem>>, %arg2: memref<16x256xbf16, #tpu.memory_space<vmem>>, %arg3: memref<16x1xf32, #tpu.memory_space<vmem>>, %arg4: memref<16x1xf32, #tpu.memory_space<vmem>>, %arg5: memref<16x256xbf16, #tpu.memory_space<vmem>>) attributes {dimension_semantics = [#tpu.dimension_semantics<parallel>], iteration_bounds = array<i64: 2>, scalar_prefetch = 0 : i64, scratch_operands = 0 : i64, tpu.core_type = #tpu.core_type<tc>, window_params = [{pipeline_mode = #tpu.pipeline_mode<synchronous>, transform_indices = @transform_0, window_bounds = array<i64: 16, 16>}, {transform_indices = @transform_1, window_bounds = array<i64: 16, 256>}, {pipeline_mode = #tpu.pipeline_mode<synchronous>, transform_indices = @transform_2, window_bounds = array<i64: 16, 1>}, {pipeline_mode = #tpu.pipeline_mode<synchronous>, transform_indices = @transform_3, window_bounds = array<i64: 16, 1>}, {transform_indices = @transform_4, window_bounds = array<i64: 16, 256>}]} {
    %c0 = arith.constant 0 : index
    %c0_0 = arith.constant 0 : index
    %0 = vector.load %arg1[%c0, %c0_0] : memref<16x16xbf16, #tpu.memory_space<vmem>>, vector<16x16xbf16>
    %c0_1 = arith.constant 0 : index
    %c0_2 = arith.constant 0 : index
    %1 = vector.load %arg2[%c0_1, %c0_2] : memref<16x256xbf16, #tpu.memory_space<vmem>>, vector<16x256xbf16>
    %cst = arith.constant dense<0.000000e+00> : vector<16x256xf32>
    %2 = tpu.matmul %0, %1, %cst {dimension_numbers = #tpu.dot_dimension_numbers<[1], [0], [0], [1], [0, 0, 1, 1], [], []>} : vector<16x16xbf16>, vector<16x256xbf16>, vector<16x256xf32> -> vector<16x256xf32>
    %c0_3 = arith.constant 0 : index
    %c0_4 = arith.constant 0 : index
    %3 = vector.load %arg3[%c0_3, %c0_4] : memref<16x1xf32, #tpu.memory_space<vmem>>, vector<16x1xf32>
    %4 = vector.broadcast %3 : vector<16x1xf32> to vector<16x256xf32>
    %5 = arith.addf %2, %4 : vector<16x256xf32>
    %cst_5 = arith.constant 0.000000e+00 : f32
    %6 = vector.broadcast %cst_5 : f32 to vector<16x256xf32>
    %7 = arith.cmpf oge, %5, %6 : vector<16x256xf32>
    %c0_6 = arith.constant 0 : index
    %c0_7 = arith.constant 0 : index
    %8 = vector.load %arg4[%c0_6, %c0_7] : memref<16x1xf32, #tpu.memory_space<vmem>>, vector<16x1xf32>
    %9 = vector.broadcast %8 : vector<16x1xf32> to vector<16x256xf32>
    %10 = arith.mulf %9, %5 : vector<16x256xf32>
    %11 = arith.select %7, %5, %10 : vector<16x256xi1>, vector<16x256xf32>
    %12 = arith.truncf %11 : vector<16x256xf32> to vector<16x256xbf16>
    %c0_8 = arith.constant 0 : index
    %c0_9 = arith.constant 0 : index
    %13 = vector.load %arg5[%c0_8, %c0_9] : memref<16x256xbf16, #tpu.memory_space<vmem>>, vector<16x256xbf16>
    tpu.vector_store %arg5[%c0_8, %c0_9], %12 {strides = array<i32>} : memref<16x256xbf16, #tpu.memory_space<vmem>>, vector<16x256xbf16>,
    return
  }
  func.func @transform_0(%arg0: i32) -> (i32, i32) {
    %c0_i32 = arith.constant 0 : i32
    %c0_i32_0 = arith.constant 0 : i32
    %c0_i32_1 = arith.constant 0 : i32
    return %c0_i32, %c0_i32_0 : i32, i32
  }
  func.func @transform_1(%arg0: i32) -> (i32, i32) {
    %c0_i32 = arith.constant 0 : i32
    %c0_i32_0 = arith.constant 0 : i32
    return %c0_i32, %arg0 : i32, i32
  }
  func.func @transform_2(%arg0: i32) -> (i32, i32) {
    %c0_i32 = arith.constant 0 : i32
    %c0_i32_0 = arith.constant 0 : i32
    %c0_i32_1 = arith.constant 0 : i32
    return %c0_i32, %c0_i32_0 : i32, i32
  }
  func.func @transform_3(%arg0: i32) -> (i32, i32) {
    %c0_i32 = arith.constant 0 : i32
    %c0_i32_0 = arith.constant 0 : i32
    %c0_i32_1 = arith.constant 0 : i32
    return %c0_i32, %c0_i32_0 : i32, i32
  }
  func.func @transform_4(%arg0: i32) -> (i32, i32) {
    %c0_i32 = arith.constant 0 : i32
    %c0_i32_0 = arith.constant 0 : i32
    return %c0_i32, %arg0 : i32, i32
  }
}

module attributes {stable_mosaic.version = 11 : i64} {
  func.func @kernel(%arg0: i32, %arg1: memref<8x16xbf16, #tpu.memory_space<vmem>>, %arg2: memref<16x256xbf16, #tpu.memory_space<vmem>>, %arg3: memref<8x1xf32, #tpu.memory_space<vmem>>, %arg4: memref<8x1xf32, #tpu.memory_space<vmem>>, %arg5: memref<8x256xbf16, #tpu.memory_space<vmem>>) attributes {dimension_semantics = [#tpu.dimension_semantics<parallel>], iteration_bounds = array<i64: 2>, scalar_prefetch = 0 : i64, scratch_operands = 0 : i64, tpu.core_type = #tpu.core_type<tc>, window_params = [{pipeline_mode = #tpu.pipeline_mode<synchronous>, transform_indices = @transform_0, window_bounds = array<i64: 8, 16>}, {transform_indices = @transform_1, window_bounds = array<i64: 16, 256>}, {pipeline_mode = #tpu.pipeline_mode<synchronous>, transform_indices = @transform_2, window_bounds = array<i64: 8, 1>}, {pipeline_mode = #tpu.pipeline_mode<synchronous>, transform_indices = @transform_3, window_bounds = array<i64: 8, 1>}, {transform_indices = @transform_4, window_bounds = array<i64: 8, 256>}]} {
    %c0 = arith.constant 0 : index
    %c0_0 = arith.constant 0 : index
    %0 = vector.load %arg1[%c0, %c0_0] : memref<8x16xbf16, #tpu.memory_space<vmem>>, vector<8x16xbf16>
    %c0_1 = arith.constant 0 : index
    %c0_2 = arith.constant 0 : index
    %1 = vector.load %arg2[%c0_1, %c0_2] : memref<16x256xbf16, #tpu.memory_space<vmem>>, vector<16x256xbf16>
    %cst = arith.constant dense<0.000000e+00> : vector<8x256xf32>
    %2 = tpu.matmul %0, %1, %cst {dimension_numbers = #tpu.dot_dimension_numbers<[1], [0], [0], [1], [0, 0, 1, 1], [], []>} : vector<8x16xbf16>, vector<16x256xbf16>, vector<8x256xf32> -> vector<8x256xf32>
    %c0_3 = arith.constant 0 : index
    %c0_4 = arith.constant 0 : index
    %3 = vector.load %arg3[%c0_3, %c0_4] : memref<8x1xf32, #tpu.memory_space<vmem>>, vector<8x1xf32>
    %4 = vector.broadcast %3 : vector<8x1xf32> to vector<8x256xf32>
    %5 = arith.addf %2, %4 : vector<8x256xf32>
    %cst_5 = arith.constant 0.000000e+00 : f32
    %6 = vector.broadcast %cst_5 : f32 to vector<8x256xf32>
    %7 = arith.subf %6, %5 : vector<8x256xf32>
    %8 = math.exp %7 : vector<8x256xf32>
    %cst_6 = arith.constant 1.000000e+00 : f32
    %9 = vector.broadcast %cst_6 : f32 to vector<8x256xf32>
    %10 = arith.addf %9, %8 : vector<8x256xf32>
    %11 = tpu.reciprocal %10 {approx = true} : vector<8x256xf32> -> vector<8x256xf32>
    %12 = arith.truncf %11 : vector<8x256xf32> to vector<8x256xbf16>
    %c0_7 = arith.constant 0 : index
    %c0_8 = arith.constant 0 : index
    %13 = vector.load %arg5[%c0_7, %c0_8] : memref<8x256xbf16, #tpu.memory_space<vmem>>, vector<8x256xbf16>
    tpu.vector_store %arg5[%c0_7, %c0_8], %12 {strides = array<i32>} : memref<8x256xbf16, #tpu.memory_space<vmem>>, vector<8x256xbf16>,
    return
  }
  func.func @transform_0(%arg0: i32) -> (i32, i32) {
    %c0_i32 = arith.constant 0 : i32
    %c0_i32_0 = arith.constant 0 : i32
    %c0_i32_1 = arith.constant 0 : i32
    return %c0_i32, %c0_i32_0 : i32, i32
  }
  func.func @transform_1(%arg0: i32) -> (i32, i32) {
    %c0_i32 = arith.constant 0 : i32
    %c0_i32_0 = arith.constant 0 : i32
    return %c0_i32, %arg0 : i32, i32
  }
  func.func @transform_2(%arg0: i32) -> (i32, i32) {
    %c0_i32 = arith.constant 0 : i32
    %c0_i32_0 = arith.constant 0 : i32
    %c0_i32_1 = arith.constant 0 : i32
    return %c0_i32, %c0_i32_0 : i32, i32
  }
  func.func @transform_3(%arg0: i32) -> (i32, i32) {
    %c0_i32 = arith.constant 0 : i32
    %c0_i32_0 = arith.constant 0 : i32
    %c0_i32_1 = arith.constant 0 : i32
    return %c0_i32, %c0_i32_0 : i32, i32
  }
  func.func @transform_4(%arg0: i32) -> (i32, i32) {
    %c0_i32 = arith.constant 0 : i32
    %c0_i32_0 = arith.constant 0 : i32
    return %c0_i32, %arg0 : i32, i32
  }
}

module attributes {stable_mosaic.version = 11 : i64} {
  func.func @kernel(%arg0: i32, %arg1: memref<8x8xbf16, #tpu.memory_space<vmem>>, %arg2: memref<8x256xbf16, #tpu.memory_space<vmem>>, %arg3: memref<8x1xf32, #tpu.memory_space<vmem>>, %arg4: memref<8x1xf32, #tpu.memory_space<vmem>>, %arg5: memref<8x256xbf16, #tpu.memory_space<vmem>>) attributes {dimension_semantics = [#tpu.dimension_semantics<parallel>], iteration_bounds = array<i64: 2>, scalar_prefetch = 0 : i64, scratch_operands = 0 : i64, tpu.core_type = #tpu.core_type<tc>, window_params = [{pipeline_mode = #tpu.pipeline_mode<synchronous>, transform_indices = @transform_0, window_bounds = array<i64: 8, 8>}, {transform_indices = @transform_1, window_bounds = array<i64: 8, 256>}, {pipeline_mode = #tpu.pipeline_mode<synchronous>, transform_indices = @transform_2, window_bounds = array<i64: 8, 1>}, {pipeline_mode = #tpu.pipeline_mode<synchronous>, transform_indices = @transform_3, window_bounds = array<i64: 8, 1>}, {transform_indices = @transform_4, window_bounds = array<i64: 8, 256>}]} {
    %c0 = arith.constant 0 : index
    %c0_0 = arith.constant 0 : index
    %0 = vector.load %arg1[%c0, %c0_0] : memref<8x8xbf16, #tpu.memory_space<vmem>>, vector<8x8xbf16>
    %c0_1 = arith.constant 0 : index
    %c0_2 = arith.constant 0 : index
    %1 = vector.load %arg2[%c0_1, %c0_2] : memref<8x256xbf16, #tpu.memory_space<vmem>>, vector<8x256xbf16>
    %cst = arith.constant dense<0.000000e+00> : vector<8x256xf32>
    %2 = tpu.matmul %0, %1, %cst {dimension_numbers = #tpu.dot_dimension_numbers<[1], [0], [0], [1], [0, 0, 1, 1], [], []>} : vector<8x8xbf16>, vector<8x256xbf16>, vector<8x256xf32> -> vector<8x256xf32>
    %c0_3 = arith.constant 0 : index
    %c0_4 = arith.constant 0 : index
    %3 = vector.load %arg3[%c0_3, %c0_4] : memref<8x1xf32, #tpu.memory_space<vmem>>, vector<8x1xf32>
    %4 = vector.broadcast %3 : vector<8x1xf32> to vector<8x256xf32>
    %5 = arith.addf %2, %4 : vector<8x256xf32>
    %cst_5 = arith.constant 0.000000e+00 : f32
    %6 = vector.broadcast %cst_5 : f32 to vector<8x256xf32>
    %7 = arith.cmpf oge, %5, %6 : vector<8x256xf32>
    %c0_6 = arith.constant 0 : index
    %c0_7 = arith.constant 0 : index
    %8 = vector.load %arg4[%c0_6, %c0_7] : memref<8x1xf32, #tpu.memory_space<vmem>>, vector<8x1xf32>
    %9 = vector.broadcast %8 : vector<8x1xf32> to vector<8x256xf32>
    %10 = arith.mulf %9, %5 : vector<8x256xf32>
    %11 = arith.select %7, %5, %10 : vector<8x256xi1>, vector<8x256xf32>
    %12 = arith.truncf %11 : vector<8x256xf32> to vector<8x256xbf16>
    %c0_8 = arith.constant 0 : index
    %c0_9 = arith.constant 0 : index
    %13 = vector.load %arg5[%c0_8, %c0_9] : memref<8x256xbf16, #tpu.memory_space<vmem>>, vector<8x256xbf16>
    tpu.vector_store %arg5[%c0_8, %c0_9], %12 {strides = array<i32>} : memref<8x256xbf16, #tpu.memory_space<vmem>>, vector<8x256xbf16>,
    return
  }
  func.func @transform_0(%arg0: i32) -> (i32, i32) {
    %c0_i32 = arith.constant 0 : i32
    %c0_i32_0 = arith.constant 0 : i32
    %c0_i32_1 = arith.constant 0 : i32
    return %c0_i32, %c0_i32_0 : i32, i32
  }
  func.func @transform_1(%arg0: i32) -> (i32, i32) {
    %c0_i32 = arith.constant 0 : i32
    %c0_i32_0 = arith.constant 0 : i32
    return %c0_i32, %arg0 : i32, i32
  }
  func.func @transform_2(%arg0: i32) -> (i32, i32) {
    %c0_i32 = arith.constant 0 : i32
    %c0_i32_0 = arith.constant 0 : i32
    %c0_i32_1 = arith.constant 0 : i32
    return %c0_i32, %c0_i32_0 : i32, i32
  }
  func.func @transform_3(%arg0: i32) -> (i32, i32) {
    %c0_i32 = arith.constant 0 : i32
    %c0_i32_0 = arith.constant 0 : i32
    %c0_i32_1 = arith.constant 0 : i32
    return %c0_i32, %c0_i32_0 : i32, i32
  }
  func.func @transform_4(%arg0: i32) -> (i32, i32) {
    %c0_i32 = arith.constant 0 : i32
    %c0_i32_0 = arith.constant 0 : i32
    return %c0_i32, %arg0 : i32, i32
  }
}

module attributes {stable_mosaic.version = 11 : i64} {
  func.func @kernel(%arg0: i32, %arg1: memref<16x16xbf16, #tpu.memory_space<vmem>>, %arg2: memref<16x256xbf16, #tpu.memory_space<vmem>>, %arg3: memref<16x1xf32, #tpu.memory_space<vmem>>, %arg4: memref<16x1xf32, #tpu.memory_space<vmem>>, %arg5: memref<8x256xbf16, #tpu.memory_space<vmem>>, %arg6: memref<8x256xbf16, #tpu.memory_space<vmem>>) attributes {dimension_semantics = [#tpu.dimension_semantics<parallel>], iteration_bounds = array<i64: 2>, scalar_prefetch = 0 : i64, scratch_operands = 0 : i64, tpu.core_type = #tpu.core_type<tc>, window_params = [{pipeline_mode = #tpu.pipeline_mode<synchronous>, transform_indices = @transform_0, window_bounds = array<i64: 16, 16>}, {transform_indices = @transform_1, window_bounds = array<i64: 16, 256>}, {pipeline_mode = #tpu.pipeline_mode<synchronous>, transform_indices = @transform_2, window_bounds = array<i64: 16, 1>}, {pipeline_mode = #tpu.pipeline_mode<synchronous>, transform_indices = @transform_3, window_bounds = array<i64: 16, 1>}, {transform_indices = @transform_4, window_bounds = array<i64: 8, 256>}, {transform_indices = @transform_5, window_bounds = array<i64: 8, 256>}]} {
    %c0 = arith.constant 0 : index
    %c0_0 = arith.constant 0 : index
    %0 = vector.load %arg1[%c0, %c0_0] : memref<16x16xbf16, #tpu.memory_space<vmem>>, vector<16x16xbf16>
    %c0_1 = arith.constant 0 : index
    %c0_2 = arith.constant 0 : index
    %1 = vector.load %arg2[%c0_1, %c0_2] : memref<16x256xbf16, #tpu.memory_space<vmem>>, vector<16x256xbf16>
    %cst = arith.constant dense<0.000000e+00> : vector<16x256xf32>
    %2 = tpu.matmul %0, %1, %cst {dimension_numbers = #tpu.dot_dimension_numbers<[1], [0], [0], [1], [0, 0, 1, 1], [], []>} : vector<16x16xbf16>, vector<16x256xbf16>, vector<16x256xf32> -> vector<16x256xf32>
    %c0_3 = arith.constant 0 : index
    %c0_4 = arith.constant 0 : index
    %3 = vector.load %arg3[%c0_3, %c0_4] : memref<16x1xf32, #tpu.memory_space<vmem>>, vector<16x1xf32>
    %4 = vector.broadcast %3 : vector<16x1xf32> to vector<16x256xf32>
    %5 = arith.addf %2, %4 : vector<16x256xf32>
    %cst_5 = arith.constant 0.000000e+00 : f32
    %6 = vector.broadcast %cst_5 : f32 to vector<16x256xf32>
    %7 = arith.cmpf oge, %5, %6 : vector<16x256xf32>
    %c0_6 = arith.constant 0 : index
    %c0_7 = arith.constant 0 : index
    %8 = vector.load %arg4[%c0_6, %c0_7] : memref<16x1xf32, #tpu.memory_space<vmem>>, vector<16x1xf32>
    %9 = vector.broadcast %8 : vector<16x1xf32> to vector<16x256xf32>
    %10 = arith.mulf %9, %5 : vector<16x256xf32>
    %11 = arith.select %7, %5, %10 : vector<16x256xi1>, vector<16x256xf32>
    %12 = vector.extract_strided_slice %11 {offsets = [0, 0], sizes = [8, 256], strides = [1, 1]} : vector<16x256xf32> to vector<8x256xf32>
    %13 = arith.truncf %12 : vector<8x256xf32> to vector<8x256xbf16>
    %c0_8 = arith.constant 0 : index
    %c0_9 = arith.constant 0 : index
    %14 = vector.load %arg5[%c0_8, %c0_9] : memref<8x256xbf16, #tpu.memory_space<vmem>>, vector<8x256xbf16>
    tpu.vector_store %arg5[%c0_8, %c0_9], %13 {strides = array<i32>} : memref<8x256xbf16, #tpu.memory_space<vmem>>, vector<8x256xbf16>,
    %15 = vector.extract_strided_slice %11 {offsets = [8, 0], sizes = [8, 256], strides = [1, 1]} : vector<16x256xf32> to vector<8x256xf32>
    %16 = arith.truncf %15 : vector<8x256xf32> to vector<8x256xbf16>
    %c0_10 = arith.constant 0 : index
    %c0_11 = arith.constant 0 : index
    %17 = vector.load %arg6[%c0_10, %c0_11] : memref<8x256xbf16, #tpu.memory_space<vmem>>, vector<8x256xbf16>
    tpu.vector_store %arg6[%c0_10, %c0_11], %16 {strides = array<i32>} : memref<8x256xbf16, #tpu.memory_space<vmem>>, vector<8x256xbf16>,
    return
  }
  func.func @transform_0(%arg0: i32) -> (i32, i32) {
    %c0_i32 = arith.constant 0 : i32
    %c0_i32_0 = arith.constant 0 : i32
    %c0_i32_1 = arith.constant 0 : i32
    return %c0_i32, %c0_i32_0 : i32, i32
  }
  func.func @transform_1(%arg0: i32) -> (i32, i32) {
    %c0_i32 = arith.constant 0 : i32
    %c0_i32_0 = arith.constant 0 : i32
    return %c0_i32, %arg0 : i32, i32
  }
  func.func @transform_2(%arg0: i32) -> (i32, i32) {
    %c0_i32 = arith.constant 0 : i32
    %c0_i32_0 = arith.constant 0 : i32
    %c0_i32_1 = arith.constant 0 : i32
    return %c0_i32, %c0_i32_0 : i32, i32
  }
  func.func @transform_3(%arg0: i32) -> (i32, i32) {
    %c0_i32 = arith.constant 0 : i32
    %c0_i32_0 = arith.constant 0 : i32
    %c0_i32_1 = arith.constant 0 : i32
    return %c0_i32, %c0_i32_0 : i32, i32
  }
  func.func @transform_4(%arg0: i32) -> (i32, i32) {
    %c0_i32 = arith.constant 0 : i32
    %c0_i32_0 = arith.constant 0 : i32
    return %c0_i32, %arg0 : i32, i32
  }
  func.func @transform_5(%arg0: i32) -> (i32, i32) {
    %c0_i32 = arith.constant 0 : i32
    %c0_i32_0 = arith.constant 0 : i32
    return %c0_i32, %arg0 : i32, i32
  }
}

module attributes {stable_mosaic.version = 11 : i64} {
  func.func @kernel(%arg0: i32, %arg1: memref<8x8xbf16, #tpu.memory_space<vmem>>, %arg2: memref<8x256xbf16, #tpu.memory_space<vmem>>, %arg3: memref<8x1xf32, #tpu.memory_space<vmem>>, %arg4: memref<8x1xf32, #tpu.memory_space<vmem>>, %arg5: memref<8x256xbf16, #tpu.memory_space<vmem>>, %arg6: memref<8x256xbf16, #tpu.memory_space<vmem>>) attributes {dimension_semantics = [#tpu.dimension_semantics<parallel>], iteration_bounds = array<i64: 2>, scalar_prefetch = 0 : i64, scratch_operands = 0 : i64, tpu.core_type = #tpu.core_type<tc>, window_params = [{pipeline_mode = #tpu.pipeline_mode<synchronous>, transform_indices = @transform_0, window_bounds = array<i64: 8, 8>}, {transform_indices = @transform_1, window_bounds = array<i64: 8, 256>}, {pipeline_mode = #tpu.pipeline_mode<synchronous>, transform_indices = @transform_2, window_bounds = array<i64: 8, 1>}, {pipeline_mode = #tpu.pipeline_mode<synchronous>, transform_indices = @transform_3, window_bounds = array<i64: 8, 1>}, {transform_indices = @transform_4, window_bounds = array<i64: 8, 256>}, {transform_indices = @transform_5, window_bounds = array<i64: 8, 256>}]} {
    %c0 = arith.constant 0 : index
    %c0_0 = arith.constant 0 : index
    %0 = vector.load %arg1[%c0, %c0_0] : memref<8x8xbf16, #tpu.memory_space<vmem>>, vector<8x8xbf16>
    %c0_1 = arith.constant 0 : index
    %c0_2 = arith.constant 0 : index
    %1 = vector.load %arg2[%c0_1, %c0_2] : memref<8x256xbf16, #tpu.memory_space<vmem>>, vector<8x256xbf16>
    %cst = arith.constant dense<0.000000e+00> : vector<8x256xf32>
    %2 = tpu.matmul %0, %1, %cst {dimension_numbers = #tpu.dot_dimension_numbers<[1], [0], [0], [1], [0, 0, 1, 1], [], []>} : vector<8x8xbf16>, vector<8x256xbf16>, vector<8x256xf32> -> vector<8x256xf32>
    %c0_3 = arith.constant 0 : index
    %c0_4 = arith.constant 0 : index
    %3 = vector.load %arg3[%c0_3, %c0_4] : memref<8x1xf32, #tpu.memory_space<vmem>>, vector<8x1xf32>
    %4 = vector.broadcast %3 : vector<8x1xf32> to vector<8x256xf32>
    %5 = arith.addf %2, %4 : vector<8x256xf32>
    %cst_5 = arith.constant 0.000000e+00 : f32
    %6 = vector.broadcast %cst_5 : f32 to vector<8x256xf32>
    %7 = arith.cmpf oge, %5, %6 : vector<8x256xf32>
    %c0_6 = arith.constant 0 : index
    %c0_7 = arith.constant 0 : index
    %8 = vector.load %arg4[%c0_6, %c0_7] : memref<8x1xf32, #tpu.memory_space<vmem>>, vector<8x1xf32>
    %9 = vector.broadcast %8 : vector<8x1xf32> to vector<8x256xf32>
    %10 = arith.mulf %9, %5 : vector<8x256xf32>
    %11 = arith.select %7, %5, %10 : vector<8x256xi1>, vector<8x256xf32>
    %c0_8 = arith.constant 0 : index
    %c0_9 = arith.constant 0 : index
    %12 = vector.load %arg5[%c0_8, %c0_9] : memref<8x256xbf16, #tpu.memory_space<vmem>>, vector<8x256xbf16>
    %13 = arith.extf %12 : vector<8x256xbf16> to vector<8x256xf32>
    %14 = arith.addf %11, %13 : vector<8x256xf32>
    %15 = arith.truncf %14 : vector<8x256xf32> to vector<8x256xbf16>
    %c0_10 = arith.constant 0 : index
    %c0_11 = arith.constant 0 : index
    %16 = vector.load %arg6[%c0_10, %c0_11] : memref<8x256xbf16, #tpu.memory_space<vmem>>, vector<8x256xbf16>
    tpu.vector_store %arg6[%c0_10, %c0_11], %15 {strides = array<i32>} : memref<8x256xbf16, #tpu.memory_space<vmem>>, vector<8x256xbf16>,
    return
  }
  func.func @transform_0(%arg0: i32) -> (i32, i32) {
    %c0_i32 = arith.constant 0 : i32
    %c0_i32_0 = arith.constant 0 : i32
    %c0_i32_1 = arith.constant 0 : i32
    return %c0_i32, %c0_i32_0 : i32, i32
  }
  func.func @transform_1(%arg0: i32) -> (i32, i32) {
    %c0_i32 = arith.constant 0 : i32
    %c0_i32_0 = arith.constant 0 : i32
    return %c0_i32, %arg0 : i32, i32
  }
  func.func @transform_2(%arg0: i32) -> (i32, i32) {
    %c0_i32 = arith.constant 0 : i32
    %c0_i32_0 = arith.constant 0 : i32
    %c0_i32_1 = arith.constant 0 : i32
    return %c0_i32, %c0_i32_0 : i32, i32
  }
  func.func @transform_3(%arg0: i32) -> (i32, i32) {
    %c0_i32 = arith.constant 0 : i32
    %c0_i32_0 = arith.constant 0 : i32
    %c0_i32_1 = arith.constant 0 : i32
    return %c0_i32, %c0_i32_0 : i32, i32
  }
  func.func @transform_4(%arg0: i32) -> (i32, i32) {
    %c0_i32 = arith.constant 0 : i32
    %c0_i32_0 = arith.constant 0 : i32
    return %c0_i32, %arg0 : i32, i32
  }
  func.func @transform_5(%arg0: i32) -> (i32, i32) {
    %c0_i32 = arith.constant 0 : i32
    %c0_i32_0 = arith.constant 0 : i32
    return %c0_i32, %arg0 : i32, i32
  }
}

module attributes {stable_mosaic.version = 11 : i64} {
  func.func @kernel(%arg0: i32, %arg1: memref<8x16xbf16, #tpu.memory_space<vmem>>, %arg2: memref<16x256xbf16, #tpu.memory_space<vmem>>, %arg3: memref<8x1xf32, #tpu.memory_space<vmem>>, %arg4: memref<8x1xf32, #tpu.memory_space<vmem>>, %arg5: memref<8x256xbf16, #tpu.memory_space<vmem>>, %arg6: memref<8x256xbf16, #tpu.memory_space<vmem>>) attributes {dimension_semantics = [#tpu.dimension_semantics<parallel>], iteration_bounds = array<i64: 2>, scalar_prefetch = 0 : i64, scratch_operands = 0 : i64, tpu.core_type = #tpu.core_type<tc>, window_params = [{pipeline_mode = #tpu.pipeline_mode<synchronous>, transform_indices = @transform_0, window_bounds = array<i64: 8, 16>}, {transform_indices = @transform_1, window_bounds = array<i64: 16, 256>}, {pipeline_mode = #tpu.pipeline_mode<synchronous>, transform_indices = @transform_2, window_bounds = array<i64: 8, 1>}, {pipeline_mode = #tpu.pipeline_mode<synchronous>, transform_indices = @transform_3, window_bounds = array<i64: 8, 1>}, {transform_indices = @transform_4, window_bounds = array<i64: 8, 256>}, {transform_indices = @transform_5, window_bounds = array<i64: 8, 256>}]} {
    %c0 = arith.constant 0 : index
    %c0_0 = arith.constant 0 : index
    %0 = vector.load %arg1[%c0, %c0_0] : memref<8x16xbf16, #tpu.memory_space<vmem>>, vector<8x16xbf16>
    %c0_1 = arith.constant 0 : index
    %c0_2 = arith.constant 0 : index
    %1 = vector.load %arg2[%c0_1, %c0_2] : memref<16x256xbf16, #tpu.memory_space<vmem>>, vector<16x256xbf16>
    %cst = arith.constant dense<0.000000e+00> : vector<8x256xf32>
    %2 = tpu.matmul %0, %1, %cst {dimension_numbers = #tpu.dot_dimension_numbers<[1], [0], [0], [1], [0, 0, 1, 1], [], []>} : vector<8x16xbf16>, vector<16x256xbf16>, vector<8x256xf32> -> vector<8x256xf32>
    %c0_3 = arith.constant 0 : index
    %c0_4 = arith.constant 0 : index
    %3 = vector.load %arg3[%c0_3, %c0_4] : memref<8x1xf32, #tpu.memory_space<vmem>>, vector<8x1xf32>
    %4 = vector.broadcast %3 : vector<8x1xf32> to vector<8x256xf32>
    %5 = arith.addf %2, %4 : vector<8x256xf32>
    %cst_5 = arith.constant 0.000000e+00 : f32
    %6 = vector.broadcast %cst_5 : f32 to vector<8x256xf32>
    %7 = arith.cmpf oge, %5, %6 : vector<8x256xf32>
    %c0_6 = arith.constant 0 : index
    %c0_7 = arith.constant 0 : index
    %8 = vector.load %arg4[%c0_6, %c0_7] : memref<8x1xf32, #tpu.memory_space<vmem>>, vector<8x1xf32>
    %9 = vector.broadcast %8 : vector<8x1xf32> to vector<8x256xf32>
    %10 = arith.mulf %9, %5 : vector<8x256xf32>
    %11 = arith.select %7, %5, %10 : vector<8x256xi1>, vector<8x256xf32>
    %c0_8 = arith.constant 0 : index
    %c0_9 = arith.constant 0 : index
    %12 = vector.load %arg5[%c0_8, %c0_9] : memref<8x256xbf16, #tpu.memory_space<vmem>>, vector<8x256xbf16>
    %13 = arith.extf %12 : vector<8x256xbf16> to vector<8x256xf32>
    %14 = arith.addf %11, %13 : vector<8x256xf32>
    %15 = arith.truncf %14 : vector<8x256xf32> to vector<8x256xbf16>
    %c0_10 = arith.constant 0 : index
    %c0_11 = arith.constant 0 : index
    %16 = vector.load %arg6[%c0_10, %c0_11] : memref<8x256xbf16, #tpu.memory_space<vmem>>, vector<8x256xbf16>
    tpu.vector_store %arg6[%c0_10, %c0_11], %15 {strides = array<i32>} : memref<8x256xbf16, #tpu.memory_space<vmem>>, vector<8x256xbf16>,
    return
  }
  func.func @transform_0(%arg0: i32) -> (i32, i32) {
    %c0_i32 = arith.constant 0 : i32
    %c0_i32_0 = arith.constant 0 : i32
    %c0_i32_1 = arith.constant 0 : i32
    return %c0_i32, %c0_i32_0 : i32, i32
  }
  func.func @transform_1(%arg0: i32) -> (i32, i32) {
    %c0_i32 = arith.constant 0 : i32
    %c0_i32_0 = arith.constant 0 : i32
    return %c0_i32, %arg0 : i32, i32
  }
  func.func @transform_2(%arg0: i32) -> (i32, i32) {
    %c0_i32 = arith.constant 0 : i32
    %c0_i32_0 = arith.constant 0 : i32
    %c0_i32_1 = arith.constant 0 : i32
    return %c0_i32, %c0_i32_0 : i32, i32
  }
  func.func @transform_3(%arg0: i32) -> (i32, i32) {
    %c0_i32 = arith.constant 0 : i32
    %c0_i32_0 = arith.constant 0 : i32
    %c0_i32_1 = arith.constant 0 : i32
    return %c0_i32, %c0_i32_0 : i32, i32
  }
  func.func @transform_4(%arg0: i32) -> (i32, i32) {
    %c0_i32 = arith.constant 0 : i32
    %c0_i32_0 = arith.constant 0 : i32
    return %c0_i32, %arg0 : i32, i32
  }
  func.func @transform_5(%arg0: i32) -> (i32, i32) {
    %c0_i32 = arith.constant 0 : i32
    %c0_i32_0 = arith.constant 0 : i32
    return %c0_i32, %arg0 : i32, i32
  }
}

module attributes {stable_mosaic.version = 11 : i64} {
  func.func @kernel(%arg0: i32, %arg1: memref<8x24xbf16, #tpu.memory_space<vmem>>, %arg2: memref<24x256xbf16, #tpu.memory_space<vmem>>, %arg3: memref<8x1xf32, #tpu.memory_space<vmem>>, %arg4: memref<8x1xf32, #tpu.memory_space<vmem>>, %arg5: memref<8x256xbf16, #tpu.memory_space<vmem>>) attributes {dimension_semantics = [#tpu.dimension_semantics<parallel>], iteration_bounds = array<i64: 2>, scalar_prefetch = 0 : i64, scratch_operands = 0 : i64, tpu.core_type = #tpu.core_type<tc>, window_params = [{pipeline_mode = #tpu.pipeline_mode<synchronous>, transform_indices = @transform_0, window_bounds = array<i64: 8, 24>}, {transform_indices = @transform_1, window_bounds = array<i64: 24, 256>}, {pipeline_mode = #tpu.pipeline_mode<synchronous>, transform_indices = @transform_2, window_bounds = array<i64: 8, 1>}, {pipeline_mode = #tpu.pipeline_mode<synchronous>, transform_indices = @transform_3, window_bounds = array<i64: 8, 1>}, {transform_indices = @transform_4, window_bounds = array<i64: 8, 256>}]} {
    %c0 = arith.constant 0 : index
    %c0_0 = arith.constant 0 : index
    %0 = vector.load %arg1[%c0, %c0_0] : memref<8x24xbf16, #tpu.memory_space<vmem>>, vector<8x24xbf16>
    %c0_1 = arith.constant 0 : index
    %c0_2 = arith.constant 0 : index
    %1 = vector.load %arg2[%c0_1, %c0_2] : memref<24x256xbf16, #tpu.memory_space<vmem>>, vector<24x256xbf16>
    %cst = arith.constant dense<0.000000e+00> : vector<8x256xf32>
    %2 = tpu.matmul %0, %1, %cst {dimension_numbers = #tpu.dot_dimension_numbers<[1], [0], [0], [1], [0, 0, 1, 1], [], []>} : vector<8x24xbf16>, vector<24x256xbf16>, vector<8x256xf32> -> vector<8x256xf32>
    %c0_3 = arith.constant 0 : index
    %c0_4 = arith.constant 0 : index
    %3 = vector.load %arg3[%c0_3, %c0_4] : memref<8x1xf32, #tpu.memory_space<vmem>>, vector<8x1xf32>
    %4 = vector.broadcast %3 : vector<8x1xf32> to vector<8x256xf32>
    %5 = arith.addf %2, %4 : vector<8x256xf32>
    %cst_5 = arith.constant 0.000000e+00 : f32
    %6 = vector.broadcast %cst_5 : f32 to vector<8x256xf32>
    %7 = arith.cmpf oge, %5, %6 : vector<8x256xf32>
    %c0_6 = arith.constant 0 : index
    %c0_7 = arith.constant 0 : index
    %8 = vector.load %arg4[%c0_6, %c0_7] : memref<8x1xf32, #tpu.memory_space<vmem>>, vector<8x1xf32>
    %9 = vector.broadcast %8 : vector<8x1xf32> to vector<8x256xf32>
    %10 = arith.mulf %9, %5 : vector<8x256xf32>
    %11 = arith.select %7, %5, %10 : vector<8x256xi1>, vector<8x256xf32>
    %12 = arith.truncf %11 : vector<8x256xf32> to vector<8x256xbf16>
    %c0_8 = arith.constant 0 : index
    %c0_9 = arith.constant 0 : index
    %13 = vector.load %arg5[%c0_8, %c0_9] : memref<8x256xbf16, #tpu.memory_space<vmem>>, vector<8x256xbf16>
    tpu.vector_store %arg5[%c0_8, %c0_9], %12 {strides = array<i32>} : memref<8x256xbf16, #tpu.memory_space<vmem>>, vector<8x256xbf16>,
    return
  }
  func.func @transform_0(%arg0: i32) -> (i32, i32) {
    %c0_i32 = arith.constant 0 : i32
    %c0_i32_0 = arith.constant 0 : i32
    %c0_i32_1 = arith.constant 0 : i32
    return %c0_i32, %c0_i32_0 : i32, i32
  }
  func.func @transform_1(%arg0: i32) -> (i32, i32) {
    %c0_i32 = arith.constant 0 : i32
    %c0_i32_0 = arith.constant 0 : i32
    return %c0_i32, %arg0 : i32, i32
  }
  func.func @transform_2(%arg0: i32) -> (i32, i32) {
    %c0_i32 = arith.constant 0 : i32
    %c0_i32_0 = arith.constant 0 : i32
    %c0_i32_1 = arith.constant 0 : i32
    return %c0_i32, %c0_i32_0 : i32, i32
  }
  func.func @transform_3(%arg0: i32) -> (i32, i32) {
    %c0_i32 = arith.constant 0 : i32
    %c0_i32_0 = arith.constant 0 : i32
    %c0_i32_1 = arith.constant 0 : i32
    return %c0_i32, %c0_i32_0 : i32, i32
  }
  func.func @transform_4(%arg0: i32) -> (i32, i32) {
    %c0_i32 = arith.constant 0 : i32
    %c0_i32_0 = arith.constant 0 : i32
    return %c0_i32, %arg0 : i32, i32
  }
}

</mosaic_0001>

<bundles_post_ra>
// kernel: efnet_fwd.22
= control target key start
LH: loop header
LB: loop body
LE: loop exit
PB: predicated region body
PF: predicated region fallthrough
CT: control target
= control target key end

     0   :  { %s774_s24 = smov 0   ;;  %s837_s0 = inlined_call_operand.vmem [shape: bf16[32,8], index: 0, kind: input, shape index: {}]   ;;  %s838_s1 = inlined_call_operand.vmem [shape: bf16[8,512], index: 1, kind: input, shape index: {}]   ;;  %s839_s2 = inlined_call_operand.vmem [shape: f32[32,1], index: 2, kind: input, shape index: {}]   ;;  %s840_s3 = inlined_call_operand.vmem [shape: f32[32,1], index: 3, kind: input, shape index: {}]   ;;  %s841_s4 = inlined_call_operand.vmem [shape: bf16[8,512], index: 4, kind: output, shape index: {0}]   ;;  %s842_s5 = inlined_call_operand.vmem [shape: bf16[8,512], index: 5, kind: output, shape index: {1}]   ;;  %s843_s6 = inlined_call_operand.vmem [shape: bf16[8,512], index: 6, kind: output, shape index: {2}]   ;;  %s844_s7 = inlined_call_operand.vmem [shape: bf16[8,512], index: 7, kind: output, shape index: {3}]  }
   0x1 LB: > { %s676_s25 = sadd.s32 4294967295, %s731_s24   ;;  %p680_p0 = scmp.ge.s32.totalorder %s731_s24, 1  ;;  %s731_s24 = sphi %s774_s24, %s18_s24  }
   0x2   : > { %p245_p1 = scmp.lt.s32.totalorder %s731_s24, 3 }
   0x4   : > { %p246_p2 = pnand %p680_p0, %p245_p1 }
   0x5   : > { %s681_s26 = sshll.u32 (!%p246_p2), %s676_s25, 1 }
   0x6   : > { %249 = sbr.rel (%p246_p2) target bundleno = 231 (0xe7), region = 36  ;;  %p293_p3 = scmp.lt.s32.totalorder (!%p246_p2), %s681_s26, 3 }
   0xb   : > { %v733_v0 = vmov 0   ;;  %v330_v1 = vld [vmem:[%s839_s2 + $0x10] sm:$0xff]  ;;  %s846_s26 = smov (!%p293_p3, %s681_s26), 3  ;;  %v328_v2 = vld [vmem:[%s839_s2] sm:$0xff]  ;;  %v331_v3 = vld [vmem:[%s839_s2 + $0x18] sm:$0xff]  ;;  %vm374_vm0 = vcmask 1043456  }
   0xc   : > { %413 = vmatprep.mubr.bf16.mxu0 %v733_v0  ;;  %423 = vmatprep.mubr.bf16.mxu1 %v733_v0  ;;  %s791_s10 = sshll.u32 %s846_s26, 2  ;;  %v329_v4 = vld [vmem:[%s839_s2 + $0x8] sm:$0xff]  ;;  %v442_v9 = vld [vmem:[%s840_s3] sm:$0xff]  ;;  %vm367_vm1 = vcmask 64512   ;;  %v445_v13 = vld [vmem:[%s840_s3 + $0x18] sm:$0xff] }
   0xd   : > { %720 = vset.pattern.permute.xlu1 %v733_v0  ;;  %719 = vset.pattern.permute.xlu0 %v733_v0  ;;  %s296_s15 = scalar_lea.vmem %s838_s1, %s791_s10  ;;  %v443_v8 = vld [vmem:[%s840_s3 + $0x8] sm:$0xff]  ;;  %v723_v11 = vld [vmem:[%s837_s0] sm:$0xff]   ;;  %v444_v14 = vld [vmem:[%s840_s3 + $0x10] sm:$0xff]  ;;  %s302_s8 = scalar_lea.vmem %s841_s4, %s791_s10 }
   0xe   : > { %344 = vperm.xlu1 %720, %v330_v1   ;;  %334 = vperm.xlu0 %719, %v328_v2   ;;  %v327_v5 = vld [vmem:[%s296_s15] sm:$0xff]  ;;  %v724_v12 = vld [vmem:[%s837_s0 + $0x8] sm:$0xff]   ;;  %s314_s12 = scalar_lea.vmem %s843_s6, %s791_s10  ;;  %s308_s15 = scalar_lea.vmem %s842_s5, %s791_s10 }
   0xf   : > { %v694_v6 = vcombine.high %v327_v5, %v327_v5  ;;  %v693_v7 = vcombine.low %v327_v5, %v327_v5  ;;  %s320_s18 = scalar_lea.vmem %s844_s7, %s791_s10 }
  0x11   : > { %695 = vmatprep.subr.msk.bf16.mxu0 %vm374_vm0, %v694_v6  ;;  %708 = vmatprep.subr.msk.bf16.mxu1 %vm374_vm0, %v694_v6  ;;  %v376_v10 = vsel %vm374_vm0, %v693_v7, 0 }
  0x12   : > { %349 = vperm.xlu1 %720, %v331_v3   ;;  %339 = vperm.xlu0 %719, %v329_v4  }
  0x13   : > { %396 = vmatpush1.bf16.msra.mxu0 %v376_v10  ;;  %709 = vmatpush1.bf16.msra.mxu1 %v376_v10 }
  0x16   : > { %453 = vperm.xlu1 %720, %v443_v8   ;;  %448 = vperm.xlu0 %719, %v442_v9  }
  0x17   : > { %696 = vmatmul.mubr.msk.bf16.vlgmr.msra.gmra.mxu0 %vm367_vm1, %v723_v11  ;;  %697 = vmatmul.mubr.msk.bf16.vlgmr.msra.gmra.mxu1 %vm367_vm1, %v724_v12 }
  0x1a   : > { %463 = vperm.xlu1 %720, %v445_v13   ;;  %458 = vperm.xlu0 %719, %v444_v14  }
  0x89   : > { %v335_v15 = vpop.permute.xlu0 %334  ;;  %v345_v16 = vpop.permute.xlu1 %344 }
  0x8d   : > { %v340_v17 = vpop.permute.xlu0 %339  ;;  %v350_v18 = vpop.permute.xlu1 %349 }
  0x91   : > { %v449_v19 = vpop.permute.xlu0 %448  ;;  %v454_v20 = vpop.permute.xlu1 %453 }
  0x95   : > { %v459_v23 = vpop.permute.xlu0 %458  ;;  %v464_v34 = vpop.permute.xlu1 %463 }
  0xd7   : > { %v415_v21 = vpop.f32.mrf.mxu0  ;;  %v425_v22 = vpop.f32.mrf.mxu1 }
  0xd8   : > { %v416_v24 = vadd.f32 %v415_v21, %v335_v15  ;;  %v426_v25 = vadd.f32 %v425_v22, %v345_v16 }
  0xd9   : > { %v417_v26 = vpop.f32.mrf.mxu0  ;;  %v427_v27 = vpop.f32.mrf.mxu1 }
  0xda   : > { %v466_v28 = vmul.f32 %v449_v19, %v416_v24  ;;  %v470_v29 = vmul.f32 %v459_v23, %v426_v25  ;;  %vm434_vm2 = vcmp.ge.f32.partialorder %v416_v24, 0.0  ;;  %vm438_vm3 = vcmp.ge.f32.partialorder %v426_v25, 0.0 }
  0xdb   : > { %v418_v30 = vadd.f32 %v417_v26, %v335_v15  ;;  %v428_v31 = vadd.f32 %v427_v27, %v345_v16  ;;  %v419_v32 = vpop.f32.mrf.mxu0  ;;  %v429_v33 = vpop.f32.mrf.mxu1 }
  0xdc   : > { %v420_v35 = vadd.f32 %v419_v32, %v340_v17  ;;  %v430_v36 = vadd.f32 %v429_v33, %v350_v18  ;;  %v474_v41 = vsel %vm434_vm2, %v416_v24, %v466_v28  ;;  %v478_v42 = vsel %vm438_vm3, %v426_v25, %v470_v29 }
  0xdd   : > { %vm435_vm4 = vcmp.ge.f32.partialorder %v418_v30, 0.0  ;;  %v467_v37 = vmul.f32 %v449_v19, %v418_v30  ;;  %vm439_vm5 = vcmp.ge.f32.partialorder %v428_v31, 0.0  ;;  %v471_v38 = vmul.f32 %v459_v23, %v428_v31  ;;  %v421_v39 = vpop.f32.mrf.mxu0  ;;  %v431_v40 = vpop.f32.mrf.mxu1 }
  0xde   : > { %v468_v43 = vmul.f32 %v454_v20, %v420_v35  ;;  %v472_v44 = vmul.f32 %v464_v34, %v430_v36  ;;  %v422_v47 = vadd.f32 %v421_v39, %v340_v17  ;;  %v432_v48 = vadd.f32 %v431_v40, %v350_v18 }
  0xdf   : > { %v475_v45 = vsel %vm435_vm4, %v418_v30, %v467_v37  ;;  %v479_v46 = vsel %vm439_vm5, %v428_v31, %v471_v38  ;;  %vm436_vm6 = vcmp.ge.f32.partialorder %v420_v35, 0.0  ;;  %vm440_vm7 = vcmp.ge.f32.partialorder %v430_v36, 0.0 }
  0xe0   : > { %v704_v49 = vpack.c.bf16 %v475_v45, %v474_v41  ;;  %v706_v50 = vpack.c.bf16 %v479_v46, %v478_v42  ;;  %vm437_vm8 = vcmp.ge.f32.partialorder %v422_v47, 0.0  ;;  %v469_v51 = vmul.f32 %v454_v20, %v422_v47 }
  0xe1   : > { %vm441_vm9 = vcmp.ge.f32.partialorder %v432_v48, 0.0  ;;  %v473_v52 = vmul.f32 %v464_v34, %v432_v48  ;;  %v476_v53 = vsel %vm436_vm6, %v420_v35, %v468_v43  ;;  %v480_v54 = vsel %vm440_vm7, %v430_v36, %v472_v44 }
  0xe2   : > { %490 = vst [vmem:[%s302_s8] sm:$0xff] %v704_v49  ;;  %508 = vst [vmem:[%s314_s12] sm:$0xff] %v706_v50  ;;  %v477_v55 = vsel %vm437_vm8, %v422_v47, %v469_v51 }
  0xe3   : > { %v481_v56 = vsel %vm441_vm9, %v432_v48, %v473_v52  ;;  %v705_v57 = vpack.c.bf16 %v477_v55, %v476_v53 }
  0xe4   : > { %v707_v58 = vpack.c.bf16 %v481_v56, %v480_v54 }
  0xe5   : > { %499 = vst [vmem:[%s308_s15] sm:$0xff] %v705_v57 }
  0xe6   : > { %517 = vst [vmem:[%s320_s18] sm:$0xff] %v707_v58 }
  0xe7 PF: > { %s18_s24 = sadd.s32 1, %s731_s24  }
  0xe8   : > { %p15_p4 = scmp.ge.s32.totalorder %s18_s24, 4  }
  0xea   :  { %17 = sbr.rel (!%p15_p4) target bundleno = 1 (0x1), region = 102 }

// kernel: efnet_fwd.23
= control target key start
LH: loop header
LB: loop body
LE: loop exit
PB: predicated region body
PF: predicated region fallthrough
CT: control target
= control target key end

     0   :  { %s486_s15 = smov 0   ;;  %s488_s16 = smov 0   ;;  %s547_s0 = inlined_call_operand.vmem [shape: bf16[8,16], index: 0, kind: input, shape index: {}]   ;;  %s548_s1 = inlined_call_operand.vmem [shape: bf16[16,512], index: 1, kind: input, shape index: {}]   ;;  %s549_s2 = inlined_call_operand.vmem [shape: f32[8,1], index: 2, kind: input, shape index: {}]   ;;  %s550_s3 = inlined_call_operand.vmem [shape: f32[8,1], index: 3, kind: input, shape index: {}]   ;;  %s551_s4 = inlined_call_operand.vmem [shape: bf16[8,512], index: 4, kind: output, shape index: {}]  }
   0x1   :  { %s490_s17 = smov 0  }
   0x2 LB: > { %s388_s18 = sadd.s32 4294967295, %s458_s17   ;;  %s503_s19 = sadd.s32 1, %s458_s17   ;;  %s458_s17 = sphi %s490_s17, %s554_s17   ;;  %s454_s16 = sphi %s488_s16, %s553_s16   ;;  %s450_s15 = sphi %s486_s15, %s552_s15  }
   0x3   : > { %s39_s20 = ssub.s32 %s458_s17, %s503_s19  ;;  %s42_s21 = sadd.s32 1, %s454_s16 }
   0x4   : > { %p40_p0 = scmp.eq.s32.totalorder %s39_s20, 0  ;;  %p49_p1 = scmp.ne.s32.totalorder %s454_s16, %s450_s15 }
   0x5   : > { %p50_p2 = scmp.eq.s32.totalorder %s458_s17, 0  ;;  %p391_p4 = scmp.ge.s32.totalorder %s458_s17, 2 }
   0x6   : > { %s512_s22 = scalar_select %p40_p0, %s454_s16, %s42_s21  }
   0x7   : > { %p51_p3 = por %p50_p2, %p49_p1  ;;  %152 = sbr.rel (%p391_p4) target bundleno = 17 (0x11), region = 28 }
   0xc   : > { %155 = sbr.rel (!%p51_p3) target bundleno = 17 (0x11), region = 32  ;;  %s157_s23 = sand.u32 (%p51_p3), 1, %s454_s16  }
   0xd   : > { %s405_s24 = sshll.u32 (%p51_p3), %s458_s17, 3  ;;  %s392_s25 = sshll.u32 (%p51_p3), %s157_s23, 4 }
   0xe   : > { %s162_s28 = scalar_lea.vmem (%p51_p3), %s548_s1, %s405_s24  ;;  %s159_s29 = scalar_lea.vmem (%p51_p3), [#allocation2], %s392_s25 }
   0xf   : > { %v193_v0 = vld [vmem:[%s162_s28] sm:$0xff] (%p51_p3)  ;;  %v195_v1 = vld [vmem:[%s162_s28 + $0x10] sm:$0xff] (%p51_p3) }
  0x10   : > { %194 = vst [vmem:[%s159_s29] sm:$0xff] (%p51_p3), %v193_v0  ;;  %196 = vst [vmem:[%s159_s29 + $0x8] sm:$0xff] (%p51_p3), %v195_v1 }
  0x11 PF: > { %p395_p5 = scmp.ge.s32.totalorder %s458_s17, 1  ;;  %p201_p6 = scmp.lt.s32.totalorder %s458_s17, 3 }
  0x13   : > { %p202_p7 = pnand %p395_p5, %p201_p6 }
  0x14   : > { %s208_s30 = sand.u32 (!%p202_p7), 1, %s450_s15   ;;  %s397_s13 = sshll.u32 (!%p202_p7), %s388_s18, 1 }
  0x15   : > { %205 = sbr.rel (%p202_p7) target bundleno = 236 (0xec), region = 70  ;;  %s396_s7 = sshll.u32 (!%p202_p7), %s208_s30, 4 }
  0x16   : > { %s210_s10 = scalar_lea.vmem (!%p202_p7), [#allocation2], %s396_s7  ;;  %p235_p8 = scmp.lt.s32.totalorder (!%p202_p7), %s397_s13, 3 }
  0x1a   : > { %v244_v2 = vld [vmem:[%s549_s2] sm:$0xff]  ;;  %v460_v3 = vmov 0   ;;  %vm260_vm0 = vcmask 130048   ;;  %s556_s13 = smov (!%p235_p8, %s397_s13), 3 }
  0x1b   : > { %296 = vmatprep.mubr.bf16.mxu0 %v460_v3  ;;  %432 = vset.pattern.permute.xlu0 %v460_v3  ;;  %v307_v4 = vld [vmem:[%s550_s3] sm:$0xff]  ;;  %s398_s14 = sshll.u32 %s556_s13, 2 }
  0x1c   : > { %247 = vperm.xlu0 %432, %v244_v2   ;;  %v433_v5 = vld [vmem:[%s210_s10 + $0x4] ss:$8 sps:$4 sm:$0xff]   ;;  %v435_v6 = vld [vmem:[%s210_s10] ss:$8 sps:$4 sm:$0xff]   ;;  %s238_s17 = scalar_lea.vmem %s551_s4, %s398_s14 }
  0x1d   : > { %278 = vmatprep.subr.bf16.mxu0 %v433_v5  ;;  %v241_v7 = vld [vmem:[%s547_s0] sm:$0xf] }
  0x1e   : > { %279 = vmatpush1.bf16.msra.mxu0 %v435_v6 }
  0x20   : > { %310 = vperm.xlu0 %432, %v307_v4  }
  0x21   : > { %401 = vmatmul.mubr.msk.bf16.vlgmr.msra.gmra.mxu0 %vm260_vm0, %v241_v7 }
  0x97   : > { %v248_v8 = vpop.permute.xlu0 %247 }
  0x9b   : > { %v311_v11 = vpop.permute.xlu0 %310 }
  0xe1   : > { %v298_v9 = vpop.f32.mrf.mxu0 }
  0xe2   : > { %v299_v10 = vadd.f32 %v298_v9, %v248_v8 }
  0xe3   : > { %v300_v12 = vpop.f32.mrf.mxu0 }
  0xe4   : > { %v313_v13 = vmul.f32 %v311_v11, %v299_v10  ;;  %v301_v14 = vadd.f32 %v300_v12, %v248_v8  ;;  %vm305_vm1 = vcmp.ge.f32.partialorder %v299_v10, 0.0 }
  0xe5   : > { %v302_v15 = vpop.f32.mrf.mxu0 }
  0xe6   : > { %vm306_vm2 = vcmp.ge.f32.partialorder %v301_v14, 0.0  ;;  %v314_v16 = vmul.f32 %v311_v11, %v301_v14  ;;  %v315_v18 = vsel %vm305_vm1, %v299_v10, %v313_v13 }
  0xe7   : > { %v303_v17 = vpop.f32.mrf.mxu0 }
  0xe8   : > { %v316_v19 = vsel %vm306_vm2, %v301_v14, %v314_v16 }
  0xe9   : > { %v406_v20 = vpack.c.bf16 %v316_v19, %v315_v18 }
  0xeb   : > { %325 = vst [vmem:[%s238_s17] sm:$0xff] %v406_v20 }
  0xec PF: > { %p11_p9 = scmp.ge.s32.totalorder %s503_s19, 4   ;;  %s552_s15 = smov %s454_s16 }
  0xed   : > { %s553_s16 = smov %s512_s22  ;;  %s554_s17 = smov %s503_s19 }
  0xee   :  { %13 = sbr.rel (!%p11_p9) target bundleno = 2 (0x2), region = 109 }

// kernel: efnet_fwd.24
= control target key start
LH: loop header
LB: loop body
LE: loop exit
PB: predicated region body
PF: predicated region fallthrough
CT: control target
= control target key end

     0   :  { %s560_s15 = smov 0   ;;  %s562_s16 = smov 0   ;;  %s639_s0 = inlined_call_operand.vmem [shape: bf16[16,16], index: 0, kind: input, shape index: {}]   ;;  %s640_s1 = inlined_call_operand.vmem [shape: bf16[16,512], index: 1, kind: input, shape index: {}]   ;;  %s641_s2 = inlined_call_operand.vmem [shape: f32[16,1], index: 2, kind: input, shape index: {}]   ;;  %s642_s3 = inlined_call_operand.vmem [shape: f32[16,1], index: 3, kind: input, shape index: {}]   ;;  %s643_s4 = inlined_call_operand.vmem [shape: bf16[16,512], index: 4, kind: output, shape index: {}]  }
   0x1   :  { %s564_s17 = smov 0  }
   0x2 LB: > { %s454_s18 = sadd.s32 4294967295, %s532_s17   ;;  %s577_s19 = sadd.s32 1, %s532_s17   ;;  %s532_s17 = sphi %s564_s17, %s647_s17   ;;  %s528_s16 = sphi %s562_s16, %s646_s16   ;;  %s524_s15 = sphi %s560_s15, %s645_s15  }
   0x3   : > { %s39_s20 = ssub.s32 %s532_s17, %s577_s19  ;;  %s42_s21 = sadd.s32 1, %s528_s16 }
   0x4   : > { %p40_p0 = scmp.eq.s32.totalorder %s39_s20, 0  ;;  %p49_p1 = scmp.ne.s32.totalorder %s528_s16, %s524_s15 }
   0x5   : > { %p50_p2 = scmp.eq.s32.totalorder %s532_s17, 0  ;;  %p121_p3 = scmp.eq.s32.totalorder %s454_s18, 1 }
   0x6   : > { %s588_s22 = scalar_select %p40_p0, %s528_s16, %s42_s21  }
   0x7   : > { %p51_p4 = por %p50_p2, %p49_p1  ;;  %p590_p5 = por %p121_p3, %p49_p1 }
   0x8   : > { %p457_p6 = scmp.ge.s32.totalorder %s532_s17, 2 }
   0xa   : > { %152 = sbr.rel (%p457_p6) target bundleno = 20 (0x14), region = 28 }
   0xf   : > { %155 = sbr.rel (!%p51_p4) target bundleno = 20 (0x14), region = 32  ;;  %s157_s24 = sand.u32 (%p51_p4), 1, %s528_s16  }
  0x10   : > { %s475_s25 = sshll.u32 (%p51_p4), %s532_s17, 3  ;;  %s458_s26 = sshll.u32 (%p51_p4), %s157_s24, 4 }
  0x11   : > { %s162_s29 = scalar_lea.vmem (%p51_p4), %s640_s1, %s475_s25  ;;  %s159_s30 = scalar_lea.vmem (%p51_p4), [#allocation2], %s458_s26 }
  0x12   : > { %v193_v0 = vld [vmem:[%s162_s29] sm:$0xff] (%p51_p4)  ;;  %v195_v1 = vld [vmem:[%s162_s29 + $0x10] sm:$0xff] (%p51_p4) }
  0x13   : > { %194 = vst [vmem:[%s159_s30] sm:$0xff] (%p51_p4), %v193_v0  ;;  %196 = vst [vmem:[%s159_s30 + $0x8] sm:$0xff] (%p51_p4), %v195_v1 }
  0x14 PF: > { %p461_p7 = scmp.ge.s32.totalorder %s532_s17, 1  ;;  %p201_p8 = scmp.lt.s32.totalorder %s532_s17, 3 }
  0x16   : > { %p202_p9 = pnand %p461_p7, %p201_p8 }
  0x17   : > { %s208_s5 = sand.u32 (!%p202_p9), 1, %s524_s15  }
  0x18   : > { %205 = sbr.rel (%p202_p9) target bundleno = 251 (0xfb), region = 70  ;;  %s603_s6 = sshll.u32 (!%p202_p9), %s208_s5, 4 }
  0x19   : > { %s210_s13 = scalar_lea.vmem (!%p202_p9), [#allocation2], %s603_s6  ;;  %s231_s24 = scalar_lea.vmem (!%p202_p9), [#allocation3], %s603_s6 }
  0x1d   : > { %v534_v2 = vmov 0   ;;  %v239_v3 = vld [vmem:[%s641_s2] sm:$0xff]  ;;  %v240_v5 = vld [vmem:[%s641_s2 + $0x8] sm:$0xff]  ;;  %vm266_vm0 = vcmask 130048   ;;  %s478_s25 = sshll.u32 (%p590_p5), %s454_s18, 3 }
  0x1e   : > { %302 = vmatprep.mubr.bf16.mxu0 %v534_v2  ;;  %504 = vset.pattern.permute.xlu0 %v534_v2  ;;  %v317_v4 = vld [vmem:[%s642_s3] sm:$0xff]  ;;  %v318_v8 = vld [vmem:[%s642_s3 + $0x8] sm:$0xff]  ;;  %s360_s28 = scalar_lea.vmem (%p590_p5), %s643_s4, %s478_s25 }
  0x1f   : > { %243 = vperm.xlu0 %504, %v239_v3   ;;  %505 = vset.pattern.permute.xlu1 %v534_v2  ;;  %v506_v6 = vld [vmem:[%s210_s13 + $0x4] ss:$8 sps:$4 sm:$0xff]   ;;  %v508_v7 = vld [vmem:[%s210_s13] ss:$8 sps:$4 sm:$0xff]  }
  0x20   : > { %321 = vperm.xlu1 %505, %v317_v4   ;;  %284 = vmatprep.subr.bf16.mxu0 %v506_v6  ;;  %v509_v9 = vld [vmem:[%s639_s0] sm:$0xff]  }
  0x21   : > { %285 = vmatpush1.bf16.msra.mxu0 %v508_v7 }
  0x23   : > { %248 = vperm.xlu0 %504, %v240_v5  }
  0x24   : > { %326 = vperm.xlu1 %505, %v318_v8   ;;  %467 = vmatmul.mubr.msk.bf16.vlgmr.msra.gmra.mxu0 %vm266_vm0, %v509_v9 }
  0x9a   : > { %v244_v10 = vpop.permute.xlu0 %243 }
  0x9b   : > { %v322_v11 = vpop.permute.xlu1 %321 }
  0x9e   : > { %v249_v17 = vpop.permute.xlu0 %248 }
  0x9f   : > { %v327_v21 = vpop.permute.xlu1 %326 }
  0xe4   : > { %v304_v12 = vpop.f32.mrf.mxu0 }
  0xe5   : > { %v305_v13 = vadd.f32 %v304_v12, %v244_v10 }
  0xe6   : > { %v306_v14 = vpop.f32.mrf.mxu0 }
  0xe7   : > { %v329_v15 = vmul.f32 %v322_v11, %v305_v13  ;;  %v307_v16 = vadd.f32 %v306_v14, %v244_v10  ;;  %vm313_vm1 = vcmp.ge.f32.partialorder %v305_v13, 0.0 }
  0xe8   : > { %v308_v18 = vpop.f32.mrf.mxu0 }
  0xe9   : > { %vm314_vm2 = vcmp.ge.f32.partialorder %v307_v16, 0.0  ;;  %v330_v19 = vmul.f32 %v322_v11, %v307_v16  ;;  %v309_v20 = vadd.f32 %v308_v18, %v249_v17  ;;  %v333_v23 = vsel %vm313_vm1, %v305_v13, %v329_v15 }
  0xea   : > { %v310_v22 = vpop.f32.mrf.mxu0 }
  0xeb   : > { %v334_v24 = vsel %vm314_vm2, %v307_v16, %v330_v19  ;;  %v331_v25 = vmul.f32 %v327_v21, %v309_v20  ;;  %v311_v26 = vadd.f32 %v310_v22, %v249_v17  ;;  %vm315_vm3 = vcmp.ge.f32.partialorder %v309_v20, 0.0 }
  0xec   : > { %v476_v27 = vpack.c.bf16 %v334_v24, %v333_v23 }
  0xed   : > { %vm316_vm4 = vcmp.ge.f32.partialorder %v311_v26, 0.0  ;;  %v332_v28 = vmul.f32 %v327_v21, %v311_v26  ;;  %v335_v29 = vsel %vm315_vm3, %v309_v20, %v331_v25 }
  0xee   : > { %349 = vst [vmem:[%s231_s24] sm:$0xff] %v476_v27  ;;  %357 = sbr.rel (!%p590_p5) target bundleno = 251 (0xfb), region = 78 }
  0xef   : > { %v336_v30 = vsel %vm316_vm4, %v311_v26, %v332_v28 }
  0xf0   : > { %v477_v31 = vpack.c.bf16 %v336_v30, %v335_v29 }
  0xf2   : > { %350 = vst [vmem:[%s231_s24 + $0x8] sm:$0xff] %v477_v31 }
  0xf5   : > { %v391_v32 = vld [vmem:[%s231_s24] sm:$0xff] }
  0xf6   : > { %392 = vst [vmem:[%s360_s28] sm:$0xff] %v391_v32 }
  0xf9   : > { %v393_v33 = vld [vmem:[%s231_s24 + $0x8] sm:$0xff] }
  0xfa   : > { %394 = vst [vmem:[%s360_s28 + $0x10] sm:$0xff] %v393_v33 }
  0xfb PF: > { %p11_p10 = scmp.ge.s32.totalorder %s577_s19, 4   ;;  %s645_s15 = smov %s528_s16 }
  0xfc   : > { %s646_s16 = smov %s588_s22  ;;  %s647_s17 = smov %s577_s19 }
  0xfd   :  { %13 = sbr.rel (!%p11_p10) target bundleno = 2 (0x2), region = 147 }

// kernel: efnet_fwd.25
= control target key start
LH: loop header
LB: loop body
LE: loop exit
PB: predicated region body
PF: predicated region fallthrough
CT: control target
= control target key end

     0   :  { %s492_s15 = smov 0   ;;  %s494_s16 = smov 0   ;;  %s550_s0 = inlined_call_operand.vmem [shape: bf16[8,16], index: 0, kind: input, shape index: {}]   ;;  %s551_s1 = inlined_call_operand.vmem [shape: bf16[16,512], index: 1, kind: input, shape index: {}]   ;;  %s552_s2 = inlined_call_operand.vmem [shape: f32[8,1], index: 2, kind: input, shape index: {}]   ;;  %s553_s3 = inlined_call_operand.vmem [shape: f32[8,1], index: 3, kind: input, shape index: {}]   ;;  %s554_s4 = inlined_call_operand.vmem [shape: bf16[8,512], index: 4, kind: output, shape index: {}]  }
   0x1   :  { %s496_s17 = smov 0  }
   0x2 LB: > { %s386_s3 = sadd.s32 4294967295, %s464_s17   ;;  %s509_s18 = sadd.s32 1, %s464_s17   ;;  %s464_s17 = sphi %s496_s17, %s557_s17   ;;  %s460_s16 = sphi %s494_s16, %s556_s16   ;;  %s456_s15 = sphi %s492_s15, %s555_s15  }
   0x3   : > { %s39_s19 = ssub.s32 %s464_s17, %s509_s18  ;;  %s42_s20 = sadd.s32 1, %s460_s16 }
   0x4   : > { %p40_p0 = scmp.eq.s32.totalorder %s39_s19, 0  ;;  %p49_p1 = scmp.ne.s32.totalorder %s460_s16, %s456_s15 }
   0x5   : > { %p50_p2 = scmp.eq.s32.totalorder %s464_s17, 0  ;;  %p389_p4 = scmp.ge.s32.totalorder %s464_s17, 2 }
   0x6   : > { %s518_s21 = scalar_select %p40_p0, %s460_s16, %s42_s20  }
   0x7   : > { %p51_p3 = por %p50_p2, %p49_p1  ;;  %152 = sbr.rel (%p389_p4) target bundleno = 17 (0x11), region = 28 }
   0xc   : > { %155 = sbr.rel (!%p51_p3) target bundleno = 17 (0x11), region = 32  ;;  %s157_s22 = sand.u32 (%p51_p3), 1, %s460_s16  }
   0xd   : > { %s403_s23 = sshll.u32 (%p51_p3), %s464_s17, 3  ;;  %s390_s24 = sshll.u32 (%p51_p3), %s157_s22, 4 }
   0xe   : > { %s162_s27 = scalar_lea.vmem (%p51_p3), %s551_s1, %s403_s23  ;;  %s159_s28 = scalar_lea.vmem (%p51_p3), [#allocation2], %s390_s24 }
   0xf   : > { %v193_v0 = vld [vmem:[%s162_s27] sm:$0xff] (%p51_p3)  ;;  %v195_v1 = vld [vmem:[%s162_s27 + $0x10] sm:$0xff] (%p51_p3) }
  0x10   : > { %194 = vst [vmem:[%s159_s28] sm:$0xff] (%p51_p3), %v193_v0  ;;  %196 = vst [vmem:[%s159_s28 + $0x8] sm:$0xff] (%p51_p3), %v195_v1 }
  0x11 PF: > { %p393_p5 = scmp.ge.s32.totalorder %s464_s17, 1  ;;  %p201_p6 = scmp.lt.s32.totalorder %s464_s17, 3 }
  0x13   : > { %p202_p7 = pnand %p393_p5, %p201_p6 }
  0x14   : > { %s208_s29 = sand.u32 (!%p202_p7), 1, %s456_s15   ;;  %s395_s10 = sshll.u32 (!%p202_p7), %s386_s3, 1 }
  0x15   : > { %205 = sbr.rel (%p202_p7) target bundleno = 266 (0x10a), region = 70  ;;  %s394_s6 = sshll.u32 (!%p202_p7), %s208_s29, 4 }
  0x16   : > { %s210_s7 = scalar_lea.vmem (!%p202_p7), [#allocation2], %s394_s6  ;;  %p235_p8 = scmp.lt.s32.totalorder (!%p202_p7), %s395_s10, 3 }
  0x1a   : > { %v244_v2 = vld [vmem:[%s552_s2] sm:$0xff]  ;;  %v466_v3 = vmov 0   ;;  %vm260_vm0 = vcmask 130048   ;;  %s559_s10 = smov (!%p235_p8, %s395_s10), 3 }
  0x1b   : > { %296 = vmatprep.mubr.bf16.mxu0 %v466_v3  ;;  %430 = vset.pattern.permute.xlu0 %v466_v3  ;;  %v431_v4 = vld [vmem:[%s210_s7 + $0x4] ss:$8 sps:$4 sm:$0xff]   ;;  %v433_v5 = vld [vmem:[%s210_s7] ss:$8 sps:$4 sm:$0xff]   ;;  %s396_s11 = sshll.u32 %s559_s10, 2 }
  0x1c   : > { %247 = vperm.xlu0 %430, %v244_v2   ;;  %278 = vmatprep.subr.bf16.mxu0 %v431_v4  ;;  %v241_v6 = vld [vmem:[%s550_s0] sm:$0xf]  ;;  %s238_s14 = scalar_lea.vmem %s554_s4, %s396_s11 }
  0x1d   : > { %279 = vmatpush1.bf16.msra.mxu0 %v433_v5 }
  0x20   : > { %399 = vmatmul.mubr.msk.bf16.vlgmr.msra.gmra.mxu0 %vm260_vm0, %v241_v6 }
  0x97   : > { %v248_v7 = vpop.permute.xlu0 %247 }
  0xe0   : > { %v298_v8 = vpop.f32.mrf.mxu0 }
  0xe1   : > { %v299_v9 = vadd.f32 %v298_v8, %v248_v7 }
  0xe2   : > { %v300_v10 = vpop.f32.mrf.mxu0 }
  0xe3   : > { %v305_v11 = vsub.f32 0.0, %v299_v9  ;;  %v301_v12 = vadd.f32 %v300_v10, %v248_v7 }
  0xe4   : > { %v302_v13 = vpop.f32.mrf.mxu0 }
  0xe5   : > { %v307_v14 = vmul.f32 1.442695, %v305_v11  ;;  %v306_v15 = vsub.f32 0.0, %v301_v12 }
  0xe6   : > { %v303_v16 = vpop.f32.mrf.mxu0 }
  0xe7   : > { %434 = vpow2.f32 %v307_v14  ;;  %v309_v17 = vmul.f32 1.442695, %v306_v15 }
  0xe9   : > { %436 = vpow2.f32 %v309_v17 }
  0xf4   : > { %v435_v18 = vpop.eup %434 }
  0xf5   : > { %v311_v19 = vadd.f32 1.0, %v435_v18 }
  0xf6   : > { %v437_v20 = vpop.eup %436 }
  0xf7   : > { %v312_v21 = vadd.f32 1.0, %v437_v20  ;;  %438 = vrcp.f32 %v311_v19 }
  0xf9   : > { %440 = vrcp.f32 %v312_v21 }
 0x104   : > { %v439_v22 = vpop.eup %438 }
 0x106   : > { %v441_v23 = vpop.eup %440 }
 0x107   : > { %v404_v24 = vpack.c.bf16 %v441_v23, %v439_v22 }
 0x109   : > { %323 = vst [vmem:[%s238_s14] sm:$0xff] %v404_v24 }
 0x10a PF: > { %p11_p9 = scmp.ge.s32.totalorder %s509_s18, 4   ;;  %s555_s15 = smov %s460_s16 }
 0x10b   : > { %s556_s16 = smov %s518_s21  ;;  %s557_s17 = smov %s509_s18 }
 0x10c   :  { %13 = sbr.rel (!%p11_p9) target bundleno = 2 (0x2), region = 109 }

// kernel: efnet_fwd.26
= control target key start
LH: loop header
LB: loop body
LE: loop exit
PB: predicated region body
PF: predicated region fallthrough
CT: control target
= control target key end

     0   :  { %s407_s15 = smov 0   ;;  %s433_s0 = inlined_call_operand.vmem [shape: bf16[8,8], index: 0, kind: input, shape index: {}]   ;;  %s434_s1 = inlined_call_operand.vmem [shape: bf16[8,512], index: 1, kind: input, shape index: {}]   ;;  %s435_s2 = inlined_call_operand.vmem [shape: f32[8,1], index: 2, kind: input, shape index: {}]   ;;  %s436_s3 = inlined_call_operand.vmem [shape: f32[8,1], index: 3, kind: input, shape index: {}]   ;;  %s437_s4 = inlined_call_operand.vmem [shape: bf16[8,512], index: 4, kind: output, shape index: {}]  }
   0x1 LB: > { %s344_s16 = sadd.s32 4294967295, %s379_s15   ;;  %p348_p0 = scmp.ge.s32.totalorder %s379_s15, 1  ;;  %s379_s15 = sphi %s407_s15, %s14_s15  }
   0x2   : > { %p163_p1 = scmp.lt.s32.totalorder %s379_s15, 3 }
   0x4   : > { %p164_p2 = pnand %p348_p0, %p163_p1 }
   0x5   : > { %s349_s17 = sshll.u32 (!%p164_p2), %s344_s16, 1 }
   0x6   : > { %167 = sbr.rel (%p164_p2) target bundleno = 224 (0xe0), region = 36  ;;  %p190_p3 = scmp.lt.s32.totalorder (!%p164_p2), %s349_s17, 3 }
   0xb   : > { %v381_v0 = vmov 0   ;;  %v204_v1 = vld [vmem:[%s435_s2] sm:$0xff]  ;;  %s439_s17 = smov (!%p190_p3, %s349_s17), 3  ;;  %vm219_vm0 = vcmask 1043456   ;;  %vm215_vm1 = vcmask 64512  }
   0xc   : > { %258 = vmatprep.mubr.bf16.mxu0 %v381_v0  ;;  %370 = vset.pattern.permute.xlu0 %v381_v0  ;;  %v269_v2 = vld [vmem:[%s436_s3] sm:$0xff]  ;;  %s350_s22 = sshll.u32 %s439_s17, 2 }
   0xd   : > { %207 = vperm.xlu0 %370, %v204_v1   ;;  %s193_s25 = scalar_lea.vmem %s434_s1, %s350_s22  ;;  %v202_v7 = vld [vmem:[%s433_s0] sm:$0xf]  ;;  %s199_s30 = scalar_lea.vmem %s437_s4, %s350_s22 }
   0xe   : > { %v203_v3 = vld [vmem:[%s193_s25] sm:$0xff] }
   0xf   : > { %v354_v4 = vcombine.high %v203_v3, %v203_v3  ;;  %v353_v5 = vcombine.low %v203_v3, %v203_v3 }
  0x11   : > { %272 = vperm.xlu0 %370, %v269_v2   ;;  %355 = vmatprep.subr.msk.bf16.mxu0 %vm219_vm0, %v354_v4  ;;  %v221_v6 = vsel %vm219_vm0, %v353_v5, 0 }
  0x12   : > { %241 = vmatpush1.bf16.msra.mxu0 %v221_v6 }
  0x15   : > { %356 = vmatmul.mubr.msk.bf16.vlgmr.msra.gmra.mxu0 %vm215_vm1, %v202_v7 }
  0x88   : > { %v208_v8 = vpop.permute.xlu0 %207 }
  0x8c   : > { %v273_v11 = vpop.permute.xlu0 %272 }
  0xd5   : > { %v260_v9 = vpop.f32.mrf.mxu0 }
  0xd6   : > { %v261_v10 = vadd.f32 %v260_v9, %v208_v8 }
  0xd7   : > { %v262_v12 = vpop.f32.mrf.mxu0 }
  0xd8   : > { %v275_v13 = vmul.f32 %v273_v11, %v261_v10  ;;  %v263_v14 = vadd.f32 %v262_v12, %v208_v8  ;;  %vm267_vm2 = vcmp.ge.f32.partialorder %v261_v10, 0.0 }
  0xd9   : > { %v264_v15 = vpop.f32.mrf.mxu0 }
  0xda   : > { %vm268_vm3 = vcmp.ge.f32.partialorder %v263_v14, 0.0  ;;  %v276_v16 = vmul.f32 %v273_v11, %v263_v14  ;;  %v277_v18 = vsel %vm267_vm2, %v261_v10, %v275_v13 }
  0xdb   : > { %v265_v17 = vpop.f32.mrf.mxu0 }
  0xdc   : > { %v278_v19 = vsel %vm268_vm3, %v263_v14, %v276_v16 }
  0xdd   : > { %v360_v20 = vpack.c.bf16 %v278_v19, %v277_v18 }
  0xdf   : > { %287 = vst [vmem:[%s199_s30] sm:$0xff] %v360_v20 }
  0xe0 PF: > { %s14_s15 = sadd.s32 1, %s379_s15  }
  0xe1   : > { %p11_p4 = scmp.ge.s32.totalorder %s14_s15, 4  }
  0xe3   :  { %13 = sbr.rel (!%p11_p4) target bundleno = 1 (0x1), region = 66 }

// kernel: efnet_fwd.28
= control target key start
LH: loop header
LB: loop body
LE: loop exit
PB: predicated region body
PF: predicated region fallthrough
CT: control target
= control target key end

     0   :  { %s608_s18 = smov 0   ;;  %s610_s19 = smov 0   ;;  %s678_s0 = inlined_call_operand.vmem [shape: bf16[16,16], index: 0, kind: input, shape index: {}]   ;;  %s679_s1 = inlined_call_operand.vmem [shape: bf16[16,512], index: 1, kind: input, shape index: {}]   ;;  %s680_s2 = inlined_call_operand.vmem [shape: f32[16,1], index: 2, kind: input, shape index: {}]   ;;  %s681_s3 = inlined_call_operand.vmem [shape: f32[16,1], index: 3, kind: input, shape index: {}]   ;;  %s682_s4 = inlined_call_operand.vmem [shape: bf16[8,512], index: 4, kind: output, shape index: {0}]   ;;  %s683_s5 = inlined_call_operand.vmem [shape: bf16[8,512], index: 5, kind: output, shape index: {1}]  }
   0x1   :  { %s612_s20 = smov 0  }
   0x2 LB: > { %s498_s21 = sadd.s32 4294967295, %s575_s20   ;;  %s625_s22 = sadd.s32 1, %s575_s20   ;;  %s575_s20 = sphi %s612_s20, %s686_s20   ;;  %s571_s19 = sphi %s610_s19, %s685_s19   ;;  %s567_s18 = sphi %s608_s18, %s684_s18  }
   0x3   : > { %s41_s23 = ssub.s32 %s575_s20, %s625_s22  ;;  %s44_s24 = sadd.s32 1, %s571_s19 }
   0x4   : > { %p42_p0 = scmp.eq.s32.totalorder %s41_s23, 0  ;;  %p51_p1 = scmp.ne.s32.totalorder %s571_s19, %s567_s18 }
   0x5   : > { %p52_p2 = scmp.eq.s32.totalorder %s575_s20, 0  ;;  %p501_p4 = scmp.ge.s32.totalorder %s575_s20, 2 }
   0x6   : > { %s634_s25 = scalar_select %p42_p0, %s571_s19, %s44_s24  }
   0x7   : > { %p53_p3 = por %p52_p2, %p51_p1  ;;  %180 = sbr.rel (%p501_p4) target bundleno = 17 (0x11), region = 28 }
   0xc   : > { %183 = sbr.rel (!%p53_p3) target bundleno = 17 (0x11), region = 32  ;;  %s185_s26 = sand.u32 (%p53_p3), 1, %s571_s19  }
   0xd   : > { %s519_s27 = sshll.u32 (%p53_p3), %s575_s20, 3  ;;  %s502_s28 = sshll.u32 (%p53_p3), %s185_s26, 4 }
   0xe   : > { %s190_s6 = scalar_lea.vmem (%p53_p3), %s679_s1, %s519_s27  ;;  %s187_s7 = scalar_lea.vmem (%p53_p3), [#allocation2], %s502_s28 }
   0xf   : > { %v221_v0 = vld [vmem:[%s190_s6] sm:$0xff] (%p53_p3)  ;;  %v223_v1 = vld [vmem:[%s190_s6 + $0x10] sm:$0xff] (%p53_p3) }
  0x10   : > { %222 = vst [vmem:[%s187_s7] sm:$0xff] (%p53_p3), %v221_v0  ;;  %224 = vst [vmem:[%s187_s7 + $0x8] sm:$0xff] (%p53_p3), %v223_v1 }
  0x11 PF: > { %p505_p5 = scmp.ge.s32.totalorder %s575_s20, 1  ;;  %p229_p6 = scmp.lt.s32.totalorder %s575_s20, 3 }
  0x13   : > { %p230_p7 = pnand %p505_p5, %p229_p6 }
  0x14   : > { %s236_s8 = sand.u32 (!%p230_p7), 1, %s567_s18   ;;  %s507_s26 = sshll.u32 (!%p230_p7), %s498_s21, 1 }
  0x15   : > { %233 = sbr.rel (%p230_p7) target bundleno = 240 (0xf0), region = 70  ;;  %s506_s9 = sshll.u32 (!%p230_p7), %s236_s8, 4 }
  0x16   : > { %s238_s16 = scalar_lea.vmem (!%p230_p7), [#allocation2], %s506_s9  ;;  %p270_p8 = scmp.lt.s32.totalorder (!%p230_p7), %s507_s26, 3 }
  0x1a   : > { %v577_v2 = vmov 0   ;;  %v286_v3 = vld [vmem:[%s680_s2] sm:$0xff]  ;;  %v287_v5 = vld [vmem:[%s680_s2 + $0x8] sm:$0xff]  ;;  %vm313_vm0 = vcmask 130048   ;;  %s688_s26 = smov (!%p270_p8, %s507_s26), 3 }
  0x1b   : > { %349 = vmatprep.mubr.bf16.mxu0 %v577_v2  ;;  %547 = vset.pattern.permute.xlu0 %v577_v2  ;;  %v364_v4 = vld [vmem:[%s681_s3] sm:$0xff]  ;;  %v365_v8 = vld [vmem:[%s681_s3 + $0x8] sm:$0xff]  ;;  %s508_s27 = sshll.u32 %s688_s26, 2 }
  0x1c   : > { %290 = vperm.xlu0 %547, %v286_v3   ;;  %548 = vset.pattern.permute.xlu1 %v577_v2  ;;  %v549_v6 = vld [vmem:[%s238_s16 + $0x4] ss:$8 sps:$4 sm:$0xff]   ;;  %v551_v7 = vld [vmem:[%s238_s16] ss:$8 sps:$4 sm:$0xff]   ;;  %s273_s28 = scalar_lea.vmem %s682_s4, %s508_s27  ;;  %s279_s6 = scalar_lea.vmem %s683_s5, %s508_s27 }
  0x1d   : > { %368 = vperm.xlu1 %548, %v364_v4   ;;  %331 = vmatprep.subr.bf16.mxu0 %v549_v6  ;;  %v552_v9 = vld [vmem:[%s678_s0] sm:$0xff]  }
  0x1e   : > { %332 = vmatpush1.bf16.msra.mxu0 %v551_v7 }
  0x20   : > { %295 = vperm.xlu0 %547, %v287_v5  }
  0x21   : > { %373 = vperm.xlu1 %548, %v365_v8   ;;  %514 = vmatmul.mubr.msk.bf16.vlgmr.msra.gmra.mxu0 %vm313_vm0, %v552_v9 }
  0x97   : > { %v291_v10 = vpop.permute.xlu0 %290 }
  0x98   : > { %v369_v11 = vpop.permute.xlu1 %368 }
  0x9b   : > { %v296_v17 = vpop.permute.xlu0 %295 }
  0x9c   : > { %v374_v21 = vpop.permute.xlu1 %373 }
  0xe1   : > { %v351_v12 = vpop.f32.mrf.mxu0 }
  0xe2   : > { %v352_v13 = vadd.f32 %v351_v12, %v291_v10 }
  0xe3   : > { %v353_v14 = vpop.f32.mrf.mxu0 }
  0xe4   : > { %v376_v15 = vmul.f32 %v369_v11, %v352_v13  ;;  %v354_v16 = vadd.f32 %v353_v14, %v291_v10  ;;  %vm360_vm1 = vcmp.ge.f32.partialorder %v352_v13, 0.0 }
  0xe5   : > { %v355_v18 = vpop.f32.mrf.mxu0 }
  0xe6   : > { %vm361_vm2 = vcmp.ge.f32.partialorder %v354_v16, 0.0  ;;  %v377_v19 = vmul.f32 %v369_v11, %v354_v16  ;;  %v356_v20 = vadd.f32 %v355_v18, %v296_v17  ;;  %v380_v23 = vsel %vm360_vm1, %v352_v13, %v376_v15 }
  0xe7   : > { %v357_v22 = vpop.f32.mrf.mxu0 }
  0xe8   : > { %v381_v24 = vsel %vm361_vm2, %v354_v16, %v377_v19  ;;  %v378_v25 = vmul.f32 %v374_v21, %v356_v20  ;;  %v358_v26 = vadd.f32 %v357_v22, %v296_v17  ;;  %vm362_vm3 = vcmp.ge.f32.partialorder %v356_v20, 0.0 }
  0xe9   : > { %v520_v27 = vpack.c.bf16 %v381_v24, %v380_v23 }
  0xea   : > { %vm363_vm4 = vcmp.ge.f32.partialorder %v358_v26, 0.0  ;;  %v379_v28 = vmul.f32 %v374_v21, %v358_v26  ;;  %v382_v29 = vsel %vm362_vm3, %v356_v20, %v378_v25 }
  0xeb   : > { %392 = vst [vmem:[%s273_s28] sm:$0xff] %v520_v27 }
  0xec   : > { %v383_v30 = vsel %vm363_vm4, %v358_v26, %v379_v28 }
  0xed   : > { %v521_v31 = vpack.c.bf16 %v383_v30, %v382_v29 }
  0xef   : > { %401 = vst [vmem:[%s279_s6] sm:$0xff] %v521_v31 }
  0xf0 PF: > { %p13_p9 = scmp.ge.s32.totalorder %s625_s22, 4   ;;  %s684_s18 = smov %s571_s19 }
  0xf1   : > { %s685_s19 = smov %s634_s25  ;;  %s686_s20 = smov %s625_s22 }
  0xf2   :  { %15 = sbr.rel (!%p13_p9) target bundleno = 2 (0x2), region = 121 }

// kernel: efnet_fwd.32
= control target key start
LH: loop header
LB: loop body
LE: loop exit
PB: predicated region body
PF: predicated region fallthrough
CT: control target
= control target key end

     0   :  { %s480_s18 = smov 0   ;;  %s514_s0 = inlined_call_operand.vmem [shape: bf16[8,8], index: 0, kind: input, shape index: {}]   ;;  %s515_s1 = inlined_call_operand.vmem [shape: bf16[8,512], index: 1, kind: input, shape index: {}]   ;;  %s516_s2 = inlined_call_operand.vmem [shape: f32[8,1], index: 2, kind: input, shape index: {}]   ;;  %s517_s3 = inlined_call_operand.vmem [shape: f32[8,1], index: 3, kind: input, shape index: {}]   ;;  %s518_s4 = inlined_call_operand.vmem [shape: bf16[8,512], index: 4, kind: input, shape index: {}]   ;;  %s519_s5 = inlined_call_operand.vmem [shape: bf16[8,512], index: 5, kind: output, shape index: {}]  }
   0x1 LB: > { %s410_s19 = sadd.s32 4294967295, %s447_s18   ;;  %p414_p0 = scmp.ge.s32.totalorder %s447_s18, 1  ;;  %s447_s18 = sphi %s480_s18, %s15_s18  }
   0x2   : > { %p199_p1 = scmp.lt.s32.totalorder %s447_s18, 3 }
   0x4   : > { %p200_p2 = pnand %p414_p0, %p199_p1 }
   0x5   : > { %s415_s20 = sshll.u32 (!%p200_p2), %s410_s19, 1 }
   0x6   : > { %203 = sbr.rel (%p200_p2) target bundleno = 226 (0xe2), region = 40  ;;  %p233_p3 = scmp.lt.s32.totalorder (!%p200_p2), %s415_s20, 3 }
   0xb   : > { %v449_v0 = vmov 0   ;;  %v253_v1 = vld [vmem:[%s516_s2] sm:$0xff]  ;;  %s521_s20 = smov (!%p233_p3, %s415_s20), 3  ;;  %vm268_vm0 = vcmask 1043456   ;;  %vm264_vm1 = vcmask 64512  }
   0xc   : > { %307 = vmatprep.mubr.bf16.mxu0 %v449_v0  ;;  %438 = vset.pattern.permute.xlu0 %v449_v0  ;;  %v318_v2 = vld [vmem:[%s517_s3] sm:$0xff]  ;;  %s494_s25 = sshll.u32 %s521_s20, 2 }
   0xd   : > { %256 = vperm.xlu0 %438, %v253_v1   ;;  %s236_s28 = scalar_lea.vmem %s515_s1, %s494_s25  ;;  %v251_v7 = vld [vmem:[%s514_s0] sm:$0xf]  ;;  %s242_s8 = scalar_lea.vmem %s518_s4, %s494_s25 }
   0xe   : > { %v252_v3 = vld [vmem:[%s236_s28] sm:$0xff]  ;;  %s248_s11 = scalar_lea.vmem %s519_s5, %s494_s25 }
   0xf   : > { %v422_v4 = vcombine.high %v252_v3, %v252_v3  ;;  %v421_v5 = vcombine.low %v252_v3, %v252_v3  ;;  %v328_v10 = vld [vmem:[%s242_s8] sm:$0xff] }
  0x10   : > { %v329_v16 = vunpack.c.l.bf16 %v328_v10  ;;  %v330_v17 = vunpack.c.h.bf16 %v328_v10 }
  0x11   : > { %321 = vperm.xlu0 %438, %v318_v2   ;;  %423 = vmatprep.subr.msk.bf16.mxu0 %vm268_vm0, %v422_v4  ;;  %v270_v6 = vsel %vm268_vm0, %v421_v5, 0 }
  0x12   : > { %290 = vmatpush1.bf16.msra.mxu0 %v270_v6 }
  0x15   : > { %424 = vmatmul.mubr.msk.bf16.vlgmr.msra.gmra.mxu0 %vm264_vm1, %v251_v7 }
  0x88   : > { %v257_v8 = vpop.permute.xlu0 %256 }
  0x8c   : > { %v322_v12 = vpop.permute.xlu0 %321 }
  0xd5   : > { %v309_v9 = vpop.f32.mrf.mxu0 }
  0xd6   : > { %v310_v11 = vadd.f32 %v309_v9, %v257_v8 }
  0xd7   : > { %v311_v13 = vpop.f32.mrf.mxu0 }
  0xd8   : > { %vm316_vm2 = vcmp.ge.f32.partialorder %v310_v11, 0.0  ;;  %v324_v14 = vmul.f32 %v322_v12, %v310_v11  ;;  %v312_v15 = vadd.f32 %v311_v13, %v257_v8 }
  0xd9   : > { %v313_v18 = vpop.f32.mrf.mxu0 }
  0xda   : > { %v326_v19 = vsel %vm316_vm2, %v310_v11, %v324_v14  ;;  %vm317_vm3 = vcmp.ge.f32.partialorder %v312_v15, 0.0  ;;  %v325_v20 = vmul.f32 %v322_v12, %v312_v15 }
  0xdb   : > { %v314_v21 = vpop.f32.mrf.mxu0  ;;  %v331_v23 = vadd.f32 %v329_v16, %v326_v19 }
  0xdc   : > { %v327_v22 = vsel %vm317_vm3, %v312_v15, %v325_v20 }
  0xdd   : > { %v332_v24 = vadd.f32 %v330_v17, %v327_v22 }
  0xdf   : > { %v428_v25 = vpack.c.bf16 %v332_v24, %v331_v23 }
  0xe1   : > { %341 = vst [vmem:[%s248_s11] sm:$0xff] %v428_v25 }
  0xe2 PF: > { %s15_s18 = sadd.s32 1, %s447_s18  }
  0xe3   : > { %p12_p4 = scmp.ge.s32.totalorder %s15_s18, 4  }
  0xe5   :  { %14 = sbr.rel (!%p12_p4) target bundleno = 1 (0x1), region = 73 }

// kernel: efnet_fwd.21
= control target key start
LH: loop header
LB: loop body
LE: loop exit
PB: predicated region body
PF: predicated region fallthrough
CT: control target
= control target key end

     0   :  { %s559_s18 = smov 0   ;;  %s561_s19 = smov 0   ;;  %s623_s0 = inlined_call_operand.vmem [shape: bf16[8,16], index: 0, kind: input, shape index: {}]   ;;  %s624_s1 = inlined_call_operand.vmem [shape: bf16[16,512], index: 1, kind: input, shape index: {}]   ;;  %s625_s2 = inlined_call_operand.vmem [shape: f32[8,1], index: 2, kind: input, shape index: {}]   ;;  %s626_s3 = inlined_call_operand.vmem [shape: f32[8,1], index: 3, kind: input, shape index: {}]   ;;  %s627_s4 = inlined_call_operand.vmem [shape: bf16[8,512], index: 4, kind: input, shape index: {}]   ;;  %s628_s5 = inlined_call_operand.vmem [shape: bf16[8,512], index: 5, kind: output, shape index: {}]  }
   0x1   :  { %s563_s20 = smov 0  }
   0x2 LB: > { %s454_s21 = sadd.s32 4294967295, %s526_s20   ;;  %s576_s22 = sadd.s32 1, %s526_s20   ;;  %s526_s20 = sphi %s563_s20, %s631_s20   ;;  %s522_s19 = sphi %s561_s19, %s630_s19   ;;  %s518_s18 = sphi %s559_s18, %s629_s18  }
   0x3   : > { %s40_s23 = ssub.s32 %s526_s20, %s576_s22  ;;  %s43_s24 = sadd.s32 1, %s522_s19 }
   0x4   : > { %p41_p0 = scmp.eq.s32.totalorder %s40_s23, 0  ;;  %p50_p1 = scmp.ne.s32.totalorder %s522_s19, %s518_s18 }
   0x5   : > { %p51_p2 = scmp.eq.s32.totalorder %s526_s20, 0  ;;  %p457_p4 = scmp.ge.s32.totalorder %s526_s20, 2 }
   0x6   : > { %s585_s25 = scalar_select %p41_p0, %s522_s19, %s43_s24  }
   0x7   : > { %p52_p3 = por %p51_p2, %p50_p1  ;;  %179 = sbr.rel (%p457_p4) target bundleno = 17 (0x11), region = 28 }
   0xc   : > { %182 = sbr.rel (!%p52_p3) target bundleno = 17 (0x11), region = 32  ;;  %s184_s26 = sand.u32 (%p52_p3), 1, %s522_s19  }
   0xd   : > { %s473_s27 = sshll.u32 (%p52_p3), %s526_s20, 3  ;;  %s458_s28 = sshll.u32 (%p52_p3), %s184_s26, 4 }
   0xe   : > { %s189_s6 = scalar_lea.vmem (%p52_p3), %s624_s1, %s473_s27  ;;  %s186_s7 = scalar_lea.vmem (%p52_p3), [#allocation2], %s458_s28 }
   0xf   : > { %v220_v0 = vld [vmem:[%s189_s6] sm:$0xff] (%p52_p3)  ;;  %v222_v1 = vld [vmem:[%s189_s6 + $0x10] sm:$0xff] (%p52_p3) }
  0x10   : > { %221 = vst [vmem:[%s186_s7] sm:$0xff] (%p52_p3), %v220_v0  ;;  %223 = vst [vmem:[%s186_s7 + $0x8] sm:$0xff] (%p52_p3), %v222_v1 }
  0x11 PF: > { %p461_p5 = scmp.ge.s32.totalorder %s526_s20, 1  ;;  %p237_p6 = scmp.lt.s32.totalorder %s526_s20, 3 }
  0x13   : > { %p238_p7 = pnand %p461_p5, %p237_p6 }
  0x14   : > { %s244_s8 = sand.u32 (!%p238_p7), 1, %s518_s18   ;;  %s463_s17 = sshll.u32 (!%p238_p7), %s454_s21, 1 }
  0x15   : > { %241 = sbr.rel (%p238_p7) target bundleno = 238 (0xee), region = 74  ;;  %s462_s11 = sshll.u32 (!%p238_p7), %s244_s8, 4 }
  0x16   : > { %s246_s14 = scalar_lea.vmem (!%p238_p7), [#allocation2], %s462_s11  ;;  %p278_p8 = scmp.lt.s32.totalorder (!%p238_p7), %s463_s17, 3 }
  0x1a   : > { %v293_v2 = vld [vmem:[%s625_s2] sm:$0xff]  ;;  %v528_v3 = vmov 0   ;;  %vm309_vm0 = vcmask 130048   ;;  %s633_s17 = smov (!%p278_p8, %s463_s17), 3 }
  0x1b   : > { %345 = vmatprep.mubr.bf16.mxu0 %v528_v3  ;;  %500 = vset.pattern.permute.xlu0 %v528_v3  ;;  %v356_v4 = vld [vmem:[%s626_s3] sm:$0xff]  ;;  %s464_s18 = sshll.u32 %s633_s17, 2 }
  0x1c   : > { %296 = vperm.xlu0 %500, %v293_v2   ;;  %v501_v5 = vld [vmem:[%s246_s14 + $0x4] ss:$8 sps:$4 sm:$0xff]   ;;  %v503_v6 = vld [vmem:[%s246_s14] ss:$8 sps:$4 sm:$0xff]   ;;  %s281_s26 = scalar_lea.vmem %s627_s4, %s464_s18  ;;  %s287_s27 = scalar_lea.vmem %s628_s5, %s464_s18 }
  0x1d   : > { %327 = vmatprep.subr.bf16.mxu0 %v501_v5  ;;  %v290_v7 = vld [vmem:[%s623_s0] sm:$0xf] }
  0x1e   : > { %328 = vmatpush1.bf16.msra.mxu0 %v503_v6  ;;  %v366_v11 = vld [vmem:[%s281_s26] sm:$0xff] }
  0x1f   : > { %v367_v16 = vunpack.c.l.bf16 %v366_v11  ;;  %v368_v17 = vunpack.c.h.bf16 %v366_v11 }
  0x20   : > { %359 = vperm.xlu0 %500, %v356_v4  }
  0x21   : > { %469 = vmatmul.mubr.msk.bf16.vlgmr.msra.gmra.mxu0 %vm309_vm0, %v290_v7 }
  0x97   : > { %v297_v8 = vpop.permute.xlu0 %296 }
  0x9b   : > { %v360_v12 = vpop.permute.xlu0 %359 }
  0xe1   : > { %v347_v9 = vpop.f32.mrf.mxu0 }
  0xe2   : > { %v348_v10 = vadd.f32 %v347_v9, %v297_v8 }
  0xe3   : > { %v349_v13 = vpop.f32.mrf.mxu0 }
  0xe4   : > { %vm354_vm1 = vcmp.ge.f32.partialorder %v348_v10, 0.0  ;;  %v362_v14 = vmul.f32 %v360_v12, %v348_v10  ;;  %v350_v15 = vadd.f32 %v349_v13, %v297_v8 }
  0xe5   : > { %v351_v18 = vpop.f32.mrf.mxu0 }
  0xe6   : > { %v364_v19 = vsel %vm354_vm1, %v348_v10, %v362_v14  ;;  %vm355_vm2 = vcmp.ge.f32.partialorder %v350_v15, 0.0  ;;  %v363_v20 = vmul.f32 %v360_v12, %v350_v15 }
  0xe7   : > { %v352_v21 = vpop.f32.mrf.mxu0  ;;  %v369_v23 = vadd.f32 %v367_v16, %v364_v19 }
  0xe8   : > { %v365_v22 = vsel %vm355_vm2, %v350_v15, %v363_v20 }
  0xe9   : > { %v370_v24 = vadd.f32 %v368_v17, %v365_v22 }
  0xeb   : > { %v474_v25 = vpack.c.bf16 %v370_v24, %v369_v23 }
  0xed   : > { %379 = vst [vmem:[%s287_s27] sm:$0xff] %v474_v25 }
  0xee PF: > { %p12_p9 = scmp.ge.s32.totalorder %s576_s22, 4   ;;  %s629_s18 = smov %s522_s19 }
  0xef   : > { %s630_s19 = smov %s585_s25  ;;  %s631_s20 = smov %s576_s22 }
  0xf0   :  { %14 = sbr.rel (!%p12_p9) target bundleno = 2 (0x2), region = 116 }

// kernel: efnet_fwd.33
= control target key start
LH: loop header
LB: loop body
LE: loop exit
PB: predicated region body
PF: predicated region fallthrough
CT: control target
= control target key end

     0   :  { %s508_s15 = smov 0   ;;  %s510_s16 = smov 0   ;;  %s569_s0 = inlined_call_operand.vmem [shape: bf16[8,24], index: 0, kind: input, shape index: {}]   ;;  %s570_s1 = inlined_call_operand.vmem [shape: bf16[24,512], index: 1, kind: input, shape index: {}]   ;;  %s571_s2 = inlined_call_operand.vmem [shape: f32[8,1], index: 2, kind: input, shape index: {}]   ;;  %s572_s3 = inlined_call_operand.vmem [shape: f32[8,1], index: 3, kind: input, shape index: {}]   ;;  %s573_s4 = inlined_call_operand.vmem [shape: bf16[8,512], index: 4, kind: output, shape index: {}]  }
   0x1   :  { %s512_s17 = smov 0  }
   0x2 LB: > { %s405_s18 = sadd.s32 4294967295, %s480_s17   ;;  %s525_s19 = sadd.s32 1, %s480_s17   ;;  %s480_s17 = sphi %s512_s17, %s576_s17   ;;  %s476_s16 = sphi %s510_s16, %s575_s16   ;;  %s472_s15 = sphi %s508_s15, %s574_s15  }
   0x3   : > { %s39_s20 = ssub.s32 %s480_s17, %s525_s19  ;;  %s42_s21 = sadd.s32 1, %s476_s16 }
   0x4   : > { %p40_p0 = scmp.eq.s32.totalorder %s39_s20, 0  ;;  %p49_p1 = scmp.ne.s32.totalorder %s476_s16, %s472_s15 }
   0x5   : > { %p50_p2 = scmp.eq.s32.totalorder %s480_s17, 0  ;;  %p408_p4 = scmp.ge.s32.totalorder %s480_s17, 2 }
   0x6   : > { %s534_s22 = scalar_select %p40_p0, %s476_s16, %s42_s21  }
   0x7   : > { %p51_p3 = por %p50_p2, %p49_p1  ;;  %152 = sbr.rel (%p408_p4) target bundleno = 18 (0x12), region = 28 }
   0xc   : > { %155 = sbr.rel (!%p51_p3) target bundleno = 18 (0x12), region = 32  ;;  %s157_s23 = sand.u32 (%p51_p3), 1, %s476_s16  }
   0xd   : > { %s423_s24 = sshll.u32 (%p51_p3), %s480_s17, 3  ;;  %s425_s25 = smul.u32 (%p51_p3), 24, %s157_s23 }
   0xe   : > { %s162_s28 = scalar_lea.vmem (%p51_p3), %s570_s1, %s423_s24 }
   0xf   : > { %v195_v0 = vld [vmem:[%s162_s28] sm:$0xff] (%p51_p3)  ;;  %v197_v1 = vld [vmem:[%s162_s28 + $0x10] sm:$0xff] (%p51_p3)  ;;  %s159_s29 = scalar_lea.vmem (%p51_p3), [#allocation2], %s425_s25 }
  0x10   : > { %v199_v2 = vld [vmem:[%s162_s28 + $0x20] sm:$0xff] (%p51_p3)  ;;  %196 = vst [vmem:[%s159_s29] sm:$0xff] (%p51_p3), %v195_v0  ;;  %198 = vst [vmem:[%s159_s29 + $0x8] sm:$0xff] (%p51_p3), %v197_v1 }
  0x11   : > { %200 = vst [vmem:[%s159_s29 + $0x10] sm:$0xff] %v199_v2 }
  0x12 PF: > { %p411_p5 = scmp.ge.s32.totalorder %s480_s17, 1  ;;  %p205_p6 = scmp.lt.s32.totalorder %s480_s17, 3 }
  0x14   : > { %p206_p7 = pnand %p411_p5, %p205_p6 }
  0x15   : > { %s212_s30 = sand.u32 (!%p206_p7), 1, %s472_s15   ;;  %s412_s13 = sshll.u32 (!%p206_p7), %s405_s18, 1 }
  0x16   : > { %209 = sbr.rel (%p206_p7) target bundleno = 241 (0xf1), region = 70  ;;  %p239_p8 = scmp.lt.s32.totalorder (!%p206_p7), %s412_s13, 3 }
  0x17   : > { %s426_s5 = smul.u32 (!%p206_p7), 24, %s212_s30 }
  0x19   : > { %s214_s10 = scalar_lea.vmem (!%p206_p7), [#allocation2], %s426_s5 }
  0x1b   : > { %v482_v3 = vmov 0   ;;  %v249_v4 = vld [vmem:[%s571_s2] sm:$0xff]  ;;  %v248_v6 = vld [vmem:[%s214_s10 + $0x10] sm:$0xff]  ;;  %vm274_vm0 = vcmask 1043456   ;;  %vm270_vm1 = vcmask 195584   ;;  %s578_s13 = smov (!%p239_p8, %s412_s13), 3 }
  0x1c   : > { %313 = vmatprep.mubr.bf16.mxu0 %v482_v3  ;;  %452 = vset.pattern.permute.xlu0 %v482_v3  ;;  %v324_v5 = vld [vmem:[%s572_s3] sm:$0xff]  ;;  %v417_v7 = vcombine.high %v248_v6, %v248_v6  ;;  %v416_v8 = vcombine.low %v248_v6, %v248_v6  ;;  %s413_s14 = sshll.u32 %s578_s13, 2 }
  0x1d   : > { %252 = vperm.xlu0 %452, %v249_v4   ;;  %v455_v9 = vld [vmem:[%s214_s10 + $0x4] ss:$8 sps:$4 sm:$0xff]   ;;  %v457_v11 = vld [vmem:[%s214_s10] ss:$8 sps:$4 sm:$0xff]   ;;  %s242_s17 = scalar_lea.vmem %s573_s4, %s413_s14 }
  0x1e   : > { %418 = vmatprep.subr.msk.bf16.mxu0 %vm274_vm0, %v417_v7  ;;  %v276_v10 = vsel %vm274_vm0, %v416_v8, 0  ;;  %v245_v12 = vld [vmem:[%s569_s0] sm:$0xf] }
  0x1f   : > { %294 = vmatpush1.bf16.msra.mxu0 %v276_v10 }
  0x20   : > { %295 = vmatprep.subr.bf16.mxu0 %v455_v9 }
  0x21   : > { %327 = vperm.xlu0 %452, %v324_v5  }
  0x23   : > { %296 = vmatpush1.bf16.msra.mxu0 %v457_v11 }
  0x26   : > { %419 = vmatmul.mubr.msk.bf16.vlgmr.msra.gmra.mxu0 %vm270_vm1, %v245_v12 }
  0x98   : > { %v253_v13 = vpop.permute.xlu0 %252 }
  0x9c   : > { %v328_v16 = vpop.permute.xlu0 %327 }
  0xe6   : > { %v315_v14 = vpop.f32.mrf.mxu0 }
  0xe7   : > { %v316_v15 = vadd.f32 %v315_v14, %v253_v13 }
  0xe8   : > { %v317_v17 = vpop.f32.mrf.mxu0 }
  0xe9   : > { %v330_v18 = vmul.f32 %v328_v16, %v316_v15  ;;  %v318_v19 = vadd.f32 %v317_v17, %v253_v13  ;;  %vm322_vm2 = vcmp.ge.f32.partialorder %v316_v15, 0.0 }
  0xea   : > { %v319_v20 = vpop.f32.mrf.mxu0 }
  0xeb   : > { %vm323_vm3 = vcmp.ge.f32.partialorder %v318_v19, 0.0  ;;  %v331_v21 = vmul.f32 %v328_v16, %v318_v19  ;;  %v332_v23 = vsel %vm322_vm2, %v316_v15, %v330_v18 }
  0xec   : > { %v320_v22 = vpop.f32.mrf.mxu0 }
  0xed   : > { %v333_v24 = vsel %vm323_vm3, %v318_v19, %v331_v21 }
  0xee   : > { %v424_v25 = vpack.c.bf16 %v333_v24, %v332_v23 }
  0xf0   : > { %342 = vst [vmem:[%s242_s17] sm:$0xff] %v424_v25 }
  0xf1 PF: > { %p11_p9 = scmp.ge.s32.totalorder %s525_s19, 4   ;;  %s574_s15 = smov %s476_s16 }
  0xf2   : > { %s575_s16 = smov %s534_s22  ;;  %s576_s17 = smov %s525_s19 }
  0xf3   :  { %13 = sbr.rel (!%p11_p9) target bundleno = 2 (0x2), region = 109 }

</bundles_post_ra>
